<compile_context>
chip_gen: v7x
topology: tpu7x:2x2x1
jax: 0.10.0
libtpu: 0.0.40
codegen_flags: <defaults>
</compile_context>

<pallas_src>
import jax
import jax.numpy as jnp
from jax import lax
from jax.experimental import pallas as pl
from jax.experimental.pallas import tpu as pltpu


def se_block_kernel(s_ref, w1_ref, b1_ref, x_ref, w2_ref, o_ref):
    """gate = sigmoid(s @ w1^T + b1);  o = (w2 * gate) @ x.   (all f32)

    s_ref : (1, C_in)          f32  squeezed SE input (x156 flattened)
    w1_ref: (C_mid, C_in)      f32  conv2d46 weight in native layout
    b1_ref: (1, C_mid)         f32  conv2d46 bias
    x_ref : (C_mid, HW)        f32  x153 flattened in native NCHW order
    w2_ref: (C_out_blk, C_mid) f32  conv2d47 weight block in native layout
    o_ref : (C_out_blk, HW)    f32
    """
    # Tiny first 1x1 conv: contract on C_in (no transpose needed, rhs is (C_mid, C_in)).
    pre = lax.dot_general(
        s_ref[...], w1_ref[...],
        dimension_numbers=(((1,), (1,)), ((), ())),
        preferred_element_type=jnp.float32)                     # (1, C_mid)
    gate = jax.nn.sigmoid(pre + b1_ref[...])                    # (1, C_mid) f32

    # Fold the SE gate into W2 (cheap broadcast of a (1, C_mid) row over C_out rows)
    # instead of materializing a gated (C_mid, HW) activation in VMEM.
    w2_gated = w2_ref[...] * gate                               # (C_out_blk, C_mid) f32

    # Second 1x1 conv in native (C, HW) layout: out = W2_gated @ X on the MXU.
    o_ref[...] = jnp.dot(w2_gated, x_ref[...],
                         preferred_element_type=jnp.float32)    # (C_out_blk, HW) f32


@jax.jit
def se_block(x156, x153, w1, b1, w2):
    """x156: (1,48,1,1)  x153: (1,768,H,W)  w1: (768,48,1,1)  b1: (768,)
    w2: (192,768,1,1)  ->  (1,192,H,W).   (Batch must be 1.)"""
    N, C_in = x156.shape[0], x156.shape[1]
    C_mid, H, W = x153.shape[1], x153.shape[2], x153.shape[3]
    C_out = w2.shape[0]
    HW = H * W
    assert N == 1, "module is defined for batch size 1"

    # Single resident block on single-TC chips (v5e/v6e).  Only split the output
    # channels 2-way on chips with two TensorCores (v7x) so each core takes half the
    # big matmul and its DMA.
    kind = jax.devices()[0].device_kind.lower()
    n_blk = 2 if ("v7" in kind or "7x" in kind) else 1
    if C_out % n_blk != 0 or (C_out // n_blk) % 8 != 0:
        n_blk = 1
    blk = C_out // n_blk

    # All wrapper ops are FREE reshapes: no transposes, no dtype converts.
    s2d = x156.reshape(N, C_in)            # (1, 48)
    w1_m = w1.reshape(C_mid, C_in)         # (768, 48)   native layout
    b1_r = b1.reshape(1, C_mid)            # (1, 768)
    x2d = x153.reshape(C_mid, HW)          # (768, 196)  native NCHW order
    w2_m = w2.reshape(C_out, C_mid)        # (192, 768)  native layout

    flops = 2 * C_in * C_mid + C_out * C_mid + 2 * C_out * C_mid * HW
    bytes_accessed = 4 * (s2d.size + w1_m.size + b1_r.size
                          + x2d.size + w2_m.size + C_out * HW)

    out2d = pl.pallas_call(
        se_block_kernel,
        out_shape=jax.ShapeDtypeStruct((C_out, HW), jnp.float32),
        grid=(n_blk,),
        in_specs=[
            pl.BlockSpec((N, C_in), lambda i: (0, 0)),
            pl.BlockSpec((C_mid, C_in), lambda i: (0, 0)),
            pl.BlockSpec((1, C_mid), lambda i: (0, 0)),
            pl.BlockSpec((C_mid, HW), lambda i: (0, 0)),
            pl.BlockSpec((blk, C_mid), lambda i: (i, 0)),
        ],
        out_specs=pl.BlockSpec((blk, HW), lambda i: (i, 0)),
        compiler_params=pltpu.CompilerParams(
            dimension_semantics=("parallel",)),
        cost_estimate=pl.CostEstimate(
            flops=flops, transcendentals=C_mid, bytes_accessed=bytes_accessed),
    )(s2d, w1_m, b1_r, x2d, w2_m)

    # Native (C, HW) layout -> NCHW is a free reshape (no transpose).
    return out2d.reshape(N, C_out, H, W)


def reference(x156, x153, w1, b1, w2):
    """Plain-JAX f32 reference of the same forward pass."""
    N, C_in = x156.shape[0], x156.shape[1]
    C_mid, H, W = x153.shape[1], x153.shape[2], x153.shape[3]
    C_out = w2.shape[0]
    s = x156.reshape(N, C_in)                                                    # (1, 48)
    gate = jax.nn.sigmoid(s @ w1.reshape(C_mid, C_in).T + b1.reshape(1, C_mid))  # (1, 768)
    scaled = x153.reshape(C_mid, H * W) * gate.reshape(C_mid, 1)                 # (768, HW)
    out = w2.reshape(C_out, C_mid) @ scaled                                      # (192, HW)
    return out.reshape(N, C_out, H, W)


if __name__ == "__main__":
    key = jax.random.PRNGKey(0)
    k1, k2, k3, k4, k5 = jax.random.split(key, 5)

    # Shapes implied by the module's forward.
    x153 = jax.random.normal(k1, (1, 768, 14, 14), dtype=jnp.float32)
    x156 = jax.random.normal(k2, (1, 48, 1, 1), dtype=jnp.float32)

    # Deterministic synthetic parameters (same shapes as the torch convs).
    w1 = 0.05 * jax.random.normal(k3, (768, 48, 1, 1), dtype=jnp.float32)   # conv2d46.weight
    b1 = 0.05 * jax.random.normal(k4, (768,), dtype=jnp.float32)            # conv2d46.bias
    w2 = 0.05 * jax.random.normal(k5, (192, 768, 1, 1), dtype=jnp.float32)  # conv2d47.weight

    out = jax.block_until_ready(se_block(x156, x153, w1, b1, w2))
    ref = reference(x156, x153, w1, b1, w2)

    assert out.shape == (1, 192, 14, 14), out.shape
    max_err = float(jnp.max(jnp.abs(out - ref)))
    assert jnp.allclose(out, ref, atol=2e-3, rtol=2e-3), max_err

    print("KERNEL_OK")
</pallas_src>

<mosaic_0001>
module attributes {stable_mosaic.version = 11 : i64} {
  func.func @se_block_kernel(%arg0: i32, %arg1: memref<1x48xf32, #tpu.memory_space<vmem>>, %arg2: memref<768x48xf32, #tpu.memory_space<vmem>>, %arg3: memref<1x768xf32, #tpu.memory_space<vmem>>, %arg4: memref<768x196xf32, #tpu.memory_space<vmem>>, %arg5: memref<192x768xf32, #tpu.memory_space<vmem>>, %arg6: memref<192x196xf32, #tpu.memory_space<vmem>>) attributes {dimension_semantics = [#tpu.dimension_semantics<parallel>], iteration_bounds = array<i64: 1>, scalar_prefetch = 0 : i64, scratch_operands = 0 : i64, tpu.core_type = #tpu.core_type<tc>, window_params = [{pipeline_mode = #tpu.pipeline_mode<synchronous>, transform_indices = @transform_0, window_bounds = array<i64: 1, 48>}, {pipeline_mode = #tpu.pipeline_mode<synchronous>, transform_indices = @transform_1, window_bounds = array<i64: 768, 48>}, {pipeline_mode = #tpu.pipeline_mode<synchronous>, transform_indices = @transform_2, window_bounds = array<i64: 1, 768>}, {pipeline_mode = #tpu.pipeline_mode<synchronous>, transform_indices = @transform_3, window_bounds = array<i64: 768, 196>}, {transform_indices = @transform_4, window_bounds = array<i64: 192, 768>}, {transform_indices = @transform_5, window_bounds = array<i64: 192, 196>}]} {
    %c0 = arith.constant 0 : index
    %c0_0 = arith.constant 0 : index
    %0 = vector.load %arg1[%c0, %c0_0] : memref<1x48xf32, #tpu.memory_space<vmem>>, vector<1x48xf32>
    %c0_1 = arith.constant 0 : index
    %c0_2 = arith.constant 0 : index
    %1 = vector.load %arg2[%c0_1, %c0_2] : memref<768x48xf32, #tpu.memory_space<vmem>>, vector<768x48xf32>
    %cst = arith.constant dense<0.000000e+00> : vector<1x768xf32>
    %2 = tpu.matmul %0, %1, %cst {dimension_numbers = #tpu.dot_dimension_numbers<[1], [1], [0], [0], [0, 0, 1, 0], [], []>} : vector<1x48xf32>, vector<768x48xf32>, vector<1x768xf32> -> vector<1x768xf32>
    %c0_3 = arith.constant 0 : index
    %c0_4 = arith.constant 0 : index
    %3 = vector.load %arg3[%c0_3, %c0_4] : memref<1x768xf32, #tpu.memory_space<vmem>>, vector<1x768xf32>
    %4 = arith.addf %2, %3 : vector<1x768xf32>
    %5 = arith.negf %4 : vector<1x768xf32>
    %6 = math.exp %5 : vector<1x768xf32>
    %cst_5 = arith.constant 1.000000e+00 : f32
    %7 = vector.broadcast %cst_5 : f32 to vector<1x768xf32>
    %8 = arith.addf %7, %6 : vector<1x768xf32>
    %9 = arith.divf %7, %8 : vector<1x768xf32>
    %c0_6 = arith.constant 0 : index
    %c0_7 = arith.constant 0 : index
    %10 = vector.load %arg5[%c0_6, %c0_7] : memref<192x768xf32, #tpu.memory_space<vmem>>, vector<192x768xf32>
    %11 = vector.broadcast %9 : vector<1x768xf32> to vector<192x768xf32>
    %12 = arith.mulf %10, %11 : vector<192x768xf32>
    %c0_8 = arith.constant 0 : index
    %c0_9 = arith.constant 0 : index
    %13 = vector.load %arg4[%c0_8, %c0_9] : memref<768x196xf32, #tpu.memory_space<vmem>>, vector<768x196xf32>
    %cst_10 = arith.constant dense<0.000000e+00> : vector<192x196xf32>
    %14 = tpu.matmul %12, %13, %cst_10 {dimension_numbers = #tpu.dot_dimension_numbers<[1], [0], [0], [1], [0, 0, 1, 1], [], []>} : vector<192x768xf32>, vector<768x196xf32>, vector<192x196xf32> -> vector<192x196xf32>
    %c0_11 = arith.constant 0 : index
    %c0_12 = arith.constant 0 : index
    %15 = vector.load %arg6[%c0_11, %c0_12] : memref<192x196xf32, #tpu.memory_space<vmem>>, vector<192x196xf32>
    tpu.vector_store %arg6[%c0_11, %c0_12], %14 {strides = array<i32>} : memref<192x196xf32, #tpu.memory_space<vmem>>, vector<192x196xf32>,
    return
  }
  func.func @transform_0(%arg0: i32) -> (i32, i32) {
    %c0_i32 = arith.constant 0 : i32
    %c0_i32_0 = arith.constant 0 : i32
    %c0_i32_1 = arith.constant 0 : i32
    return %c0_i32, %c0_i32_0 : i32, i32
  }
  func.func @transform_1(%arg0: i32) -> (i32, i32) {
    %c0_i32 = arith.constant 0 : i32
    %c0_i32_0 = arith.constant 0 : i32
    %c0_i32_1 = arith.constant 0 : i32
    return %c0_i32, %c0_i32_0 : i32, i32
  }
  func.func @transform_2(%arg0: i32) -> (i32, i32) {
    %c0_i32 = arith.constant 0 : i32
    %c0_i32_0 = arith.constant 0 : i32
    %c0_i32_1 = arith.constant 0 : i32
    return %c0_i32, %c0_i32_0 : i32, i32
  }
  func.func @transform_3(%arg0: i32) -> (i32, i32) {
    %c0_i32 = arith.constant 0 : i32
    %c0_i32_0 = arith.constant 0 : i32
    %c0_i32_1 = arith.constant 0 : i32
    return %c0_i32, %c0_i32_0 : i32, i32
  }
  func.func @transform_4(%arg0: i32) -> (i32, i32) {
    %c0_i32 = arith.constant 0 : i32
    %c0_i32_0 = arith.constant 0 : i32
    return %arg0, %c0_i32 : i32, i32
  }
  func.func @transform_5(%arg0: i32) -> (i32, i32) {
    %c0_i32 = arith.constant 0 : i32
    %c0_i32_0 = arith.constant 0 : i32
    return %arg0, %c0_i32 : i32, i32
  }
}

</mosaic_0001>

<bundles_post_ra>
// kernel: se_block.1
= control target key start
LH: loop header
LB: loop body
LE: loop exit
PB: predicated region body
PF: predicated region fallthrough
CT: control target
= control target key end

     0   :  { %vm149_vm0 = vcmask 392192   ;;  %vm1822_vm2 = vcmask 556032   ;;  %s4608_s1 = inlined_call_operand.vmem [shape: f32[768,48], index: 1, kind: input, shape index: {}]   ;;  %s4609_s0 = inlined_call_operand.vmem [shape: f32[1,48], index: 0, kind: input, shape index: {}]   ;;  %s4610_s3 = inlined_call_operand.vmem [shape: f32[768,196], index: 3, kind: input, shape index: {}]   ;;  %s4611_s2 = inlined_call_operand.vmem [shape: f32[1,768], index: 2, kind: input, shape index: {}]   ;;  %s4612_s4 = inlined_call_operand.vmem [shape: f32[192,768], index: 4, kind: input, shape index: {}]   ;;  %s4613_s5 = inlined_call_operand.vmem [shape: f32[192,196], index: 5, kind: output, shape index: {}]  }
   0x1   :  { %v37_v0 = vld [vmem:[%s4608_s1 + $0x80] sm:$0xff]  ;;  %v38_v1 = vld [vmem:[%s4608_s1 + $0x88] sm:$0xff]  ;;  %vm2607_vm1 = vmpackc.low %vm149_vm0, %vm149_vm0 }
   0x2   :  { %v2081_v3 = vpack.c.bf16 %v38_v1, %v37_v0  ;;  %v69_v4 = vld [vmem:[%s4608_s1 + $0x180] sm:$0xff]  ;;  %v70_v5 = vld [vmem:[%s4608_s1 + $0x188] sm:$0xff]  ;;  %v39_v13 = vld [vmem:[%s4608_s1 + $0x90] sm:$0xff] }
   0x3   :  { %v21_v6 = vld [vmem:[%s4608_s1] sm:$0xff]  ;;  %v2129_v7 = vpack.c.bf16 %v70_v5, %v69_v4  ;;  %v22_v8 = vld [vmem:[%s4608_s1 + $0x8] sm:$0xff]  ;;  %v40_v14 = vld [vmem:[%s4608_s1 + $0x98] sm:$0xff] }
   0x4   :  { %v53_v9 = vld [vmem:[%s4608_s1 + $0x100] sm:$0xff]  ;;  %v54_v10 = vld [vmem:[%s4608_s1 + $0x108] sm:$0xff]  ;;  %2083 = vmatprep.subr.msk.bf16.mxu0 %vm2607_vm1, %v2081_v3  ;;  %v2084_v11 = vpack.c.bf16 %v22_v8, %v21_v6  ;;  %v71_v15 = vld [vmem:[%s4608_s1 + $0x190] sm:$0xff]  ;;  %v2087_v16 = vpack.c.bf16 %v40_v14, %v39_v13 }
   0x5   :  { %v2132_v12 = vpack.c.bf16 %v54_v10, %v53_v9  ;;  %2131 = vmatprep.subr.msk.bf16.mxu1 %vm2607_vm1, %v2129_v7  ;;  %v72_v17 = vld [vmem:[%s4608_s1 + $0x198] sm:$0xff]  ;;  %v23_v19 = vld [vmem:[%s4608_s1 + $0x10] sm:$0xff]  ;;  %v41_v23 = vld [vmem:[%s4608_s1 + $0xa0] sm:$0xff] }
   0x6   :  { %2086 = vmatpush3.bf16.xpose.msk.msra.mxu0 %vm2607_vm1, %v2084_v11  ;;  %v2135_v18 = vpack.c.bf16 %v72_v17, %v71_v15  ;;  %v24_v20 = vld [vmem:[%s4608_s1 + $0x18] sm:$0xff]  ;;  %v55_v21 = vld [vmem:[%s4608_s1 + $0x110] sm:$0xff]  ;;  %v42_v24 = vld [vmem:[%s4608_s1 + $0xa8] sm:$0xff] }
   0x7   :  { %2134 = vmatpush3.bf16.xpose.msk.msra.mxu1 %vm2607_vm1, %v2132_v12  ;;  %2089 = vmatprep.subr.msk.bf16.mxu0 %vm2607_vm1, %v2087_v16  ;;  %v56_v22 = vld [vmem:[%s4608_s1 + $0x118] sm:$0xff]  ;;  %v73_v25 = vld [vmem:[%s4608_s1 + $0x1a0] sm:$0xff]  ;;  %v74_v26 = vld [vmem:[%s4608_s1 + $0x1a8] sm:$0xff]  ;;  %v2090_v27 = vpack.c.bf16 %v24_v20, %v23_v19  ;;  %v2093_v29 = vpack.c.bf16 %v42_v24, %v41_v23 }
   0x8   :  { %2137 = vmatprep.subr.msk.bf16.mxu1 %vm2607_vm1, %v2135_v18  ;;  %v2138_v28 = vpack.c.bf16 %v56_v22, %v55_v21  ;;  %v2141_v30 = vpack.c.bf16 %v74_v26, %v73_v25  ;;  %v25_v31 = vld [vmem:[%s4608_s1 + $0x20] sm:$0xff]  ;;  %v26_v32 = vld [vmem:[%s4608_s1 + $0x28] sm:$0xff]  ;;  %v43_v35 = vld [vmem:[%s4608_s1 + $0xb0] sm:$0xff] }
   0x9   :  { %v57_v33 = vld [vmem:[%s4608_s1 + $0x120] sm:$0xff]  ;;  %v58_v34 = vld [vmem:[%s4608_s1 + $0x128] sm:$0xff]  ;;  %v44_v36 = vld [vmem:[%s4608_s1 + $0xb8] sm:$0xff]  ;;  %v2096_v39 = vpack.c.bf16 %v26_v32, %v25_v31 }
   0xa   :  { %v75_v37 = vld [vmem:[%s4608_s1 + $0x1b0] sm:$0xff]  ;;  %v76_v38 = vld [vmem:[%s4608_s1 + $0x1b8] sm:$0xff]  ;;  %v2144_v40 = vpack.c.bf16 %v58_v34, %v57_v33  ;;  %v2099_v41 = vpack.c.bf16 %v44_v36, %v43_v35  ;;  %v2722_v45 = vld [vmem:[%s4609_s0] sm:$0x1] }
   0xb   :  { %v2147_v42 = vpack.c.bf16 %v76_v38, %v75_v37  ;;  %v27_v43 = vld [vmem:[%s4608_s1 + $0x30] sm:$0xff]  ;;  %v28_v44 = vld [vmem:[%s4608_s1 + $0x38] sm:$0xff]  ;;  %v45_v48 = vld [vmem:[%s4608_s1 + $0xc0] sm:$0xff]  ;;  %2011 = vmatprep.mubr.msk.f32.mxu0 %vm149_vm0, %v2722_v45  ;;  %2045 = vmatprep.mubr.msk.f32.mxu1 %vm149_vm0, %v2722_v45 }
   0xc   :  { %v59_v46 = vld [vmem:[%s4608_s1 + $0x130] sm:$0xff]  ;;  %v60_v47 = vld [vmem:[%s4608_s1 + $0x138] sm:$0xff]  ;;  %v46_v49 = vld [vmem:[%s4608_s1 + $0xc8] sm:$0xff]  ;;  %v2102_v52 = vpack.c.bf16 %v28_v44, %v27_v43 }
   0xd   :  { %v77_v50 = vld [vmem:[%s4608_s1 + $0x1c0] sm:$0xff]  ;;  %v78_v51 = vld [vmem:[%s4608_s1 + $0x1c8] sm:$0xff]  ;;  %v2150_v53 = vpack.c.bf16 %v60_v47, %v59_v46  ;;  %v2105_v54 = vpack.c.bf16 %v46_v49, %v45_v48  ;;  %v47_v60 = vld [vmem:[%s4608_s1 + $0xd0] sm:$0xff] }
   0xe   :  { %2092 = vmatpush3.bf16.xpose.msk.msra.mxu0 %vm2607_vm1, %v2090_v27  ;;  %v2153_v55 = vpack.c.bf16 %v78_v51, %v77_v50  ;;  %v29_v56 = vld [vmem:[%s4608_s1 + $0x40] sm:$0xff]  ;;  %v30_v57 = vld [vmem:[%s4608_s1 + $0x48] sm:$0xff]  ;;  %v48_v61 = vld [vmem:[%s4608_s1 + $0xd8] sm:$0xff] }
   0xf   :  { %2140 = vmatpush3.bf16.xpose.msk.msra.mxu1 %vm2607_vm1, %v2138_v28  ;;  %2095 = vmatprep.subr.msk.bf16.mxu0 %vm2607_vm1, %v2093_v29  ;;  %v61_v58 = vld [vmem:[%s4608_s1 + $0x140] sm:$0xff]  ;;  %v62_v59 = vld [vmem:[%s4608_s1 + $0x148] sm:$0xff]  ;;  %v79_v62 = vld [vmem:[%s4608_s1 + $0x1d0] sm:$0xff]  ;;  %v2108_v0 = vpack.c.bf16 %v30_v57, %v29_v56  ;;  %v2111_v3 = vpack.c.bf16 %v48_v61, %v47_v60 }
  0x10   :  { %2143 = vmatprep.subr.msk.bf16.mxu1 %vm2607_vm1, %v2141_v30  ;;  %v80_v63 = vld [vmem:[%s4608_s1 + $0x1d8] sm:$0xff]  ;;  %v2156_v1 = vpack.c.bf16 %v62_v59, %v61_v58  ;;  %v31_v5 = vld [vmem:[%s4608_s1 + $0x50] sm:$0xff]  ;;  %v49_v9 = vld [vmem:[%s4608_s1 + $0xe0] sm:$0xff] }
  0x11   :  { %v2159_v4 = vpack.c.bf16 %v80_v63, %v79_v62  ;;  %v32_v6 = vld [vmem:[%s4608_s1 + $0x58] sm:$0xff]  ;;  %v63_v7 = vld [vmem:[%s4608_s1 + $0x150] sm:$0xff]  ;;  %v50_v10 = vld [vmem:[%s4608_s1 + $0xe8] sm:$0xff] }
  0x12   :  { %v64_v8 = vld [vmem:[%s4608_s1 + $0x158] sm:$0xff]  ;;  %v81_v11 = vld [vmem:[%s4608_s1 + $0x1e0] sm:$0xff]  ;;  %v82_v12 = vld [vmem:[%s4608_s1 + $0x1e8] sm:$0xff]  ;;  %v2114_v13 = vpack.c.bf16 %v32_v6, %v31_v5  ;;  %v2117_v15 = vpack.c.bf16 %v50_v10, %v49_v9 }
  0x13   :  { %v2162_v14 = vpack.c.bf16 %v64_v8, %v63_v7  ;;  %v2165_v16 = vpack.c.bf16 %v82_v12, %v81_v11  ;;  %v33_v17 = vld [vmem:[%s4608_s1 + $0x60] sm:$0xff]  ;;  %v34_v18 = vld [vmem:[%s4608_s1 + $0x68] sm:$0xff]  ;;  %v51_v21 = vld [vmem:[%s4608_s1 + $0xf0] sm:$0xff] }
  0x14   :  { %v65_v19 = vld [vmem:[%s4608_s1 + $0x160] sm:$0xff]  ;;  %v66_v20 = vld [vmem:[%s4608_s1 + $0x168] sm:$0xff]  ;;  %v52_v22 = vld [vmem:[%s4608_s1 + $0xf8] sm:$0xff]  ;;  %v2120_v25 = vpack.c.bf16 %v34_v18, %v33_v17 }
  0x15   :  { %v83_v23 = vld [vmem:[%s4608_s1 + $0x1f0] sm:$0xff]  ;;  %v84_v24 = vld [vmem:[%s4608_s1 + $0x1f8] sm:$0xff]  ;;  %v2168_v26 = vpack.c.bf16 %v66_v20, %v65_v19  ;;  %v2123_v27 = vpack.c.bf16 %v52_v22, %v51_v21  ;;  %v101_v33 = vld [vmem:[%s4608_s1 + $0x280] sm:$0xff] }
  0x16   :  { %2098 = vmatpush3.bf16.xpose.msk.msra.mxu0 %vm2607_vm1, %v2096_v39  ;;  %v2171_v28 = vpack.c.bf16 %v84_v24, %v83_v23  ;;  %v35_v29 = vld [vmem:[%s4608_s1 + $0x70] sm:$0xff]  ;;  %v36_v30 = vld [vmem:[%s4608_s1 + $0x78] sm:$0xff]  ;;  %v102_v34 = vld [vmem:[%s4608_s1 + $0x288] sm:$0xff] }
  0x17   :  { %2146 = vmatpush3.bf16.xpose.msk.msra.mxu1 %vm2607_vm1, %v2144_v40  ;;  %2101 = vmatprep.subr.msk.bf16.mxu0 %vm2607_vm1, %v2099_v41  ;;  %v67_v31 = vld [vmem:[%s4608_s1 + $0x170] sm:$0xff]  ;;  %v68_v32 = vld [vmem:[%s4608_s1 + $0x178] sm:$0xff]  ;;  %v1067_v35 = vld [vmem:[%s4610_s3 + $0x208] sm:$0xff]  ;;  %v2126_v37 = vpack.c.bf16 %v36_v30, %v35_v29  ;;  %v2177_v39 = vpack.c.bf16 %v102_v34, %v101_v33 }
  0x18   :  { %2149 = vmatprep.subr.msk.bf16.mxu1 %vm2607_vm1, %v2147_v42  ;;  %v1069_v36 = vld [vmem:[%s4610_s3 + $0x218] sm:$0xff]  ;;  %v2174_v38 = vpack.c.bf16 %v68_v32, %v67_v31  ;;  %v85_v41 = vld [vmem:[%s4608_s1 + $0x200] sm:$0xff]  ;;  %v86_v42 = vld [vmem:[%s4608_s1 + $0x208] sm:$0xff] }
  0x19   :  { %v2878_v40 = vpack.c.bf16 %v1069_v36, %v1067_v35  ;;  %v103_v43 = vld [vmem:[%s4608_s1 + $0x290] sm:$0xff]  ;;  %v104_v44 = vld [vmem:[%s4608_s1 + $0x298] sm:$0xff]  ;;  %v1066_v46 = vld [vmem:[%s4610_s3 + $0x200] sm:$0xff]  ;;  %v2180_v50 = vpack.c.bf16 %v86_v42, %v85_v41 }
  0x1a   :  { %v1068_v47 = vld [vmem:[%s4610_s3 + $0x210] sm:$0xff]  ;;  %v1071_v48 = vld [vmem:[%s4610_s3 + $0x228] sm:$0xff]  ;;  %v1073_v49 = vld [vmem:[%s4610_s3 + $0x238] sm:$0xff]  ;;  %v2183_v51 = vpack.c.bf16 %v104_v44, %v103_v43 }
  0x1b   :  { %v1075_v56 = vld [vmem:[%s4610_s3 + $0x248] sm:$0xff]  ;;  %v1077_v57 = vld [vmem:[%s4610_s3 + $0x258] sm:$0xff]  ;;  %v87_v58 = vld [vmem:[%s4608_s1 + $0x210] sm:$0xff] }
  0x1c   :  { %v88_v59 = vld [vmem:[%s4608_s1 + $0x218] sm:$0xff]  ;;  %v105_v60 = vld [vmem:[%s4608_s1 + $0x2a0] sm:$0xff]  ;;  %v106_v62 = vld [vmem:[%s4608_s1 + $0x2a8] sm:$0xff]  ;;  %v2953_v63 = vpack.c.bf16 %v1077_v57, %v1075_v56 }
  0x1d   :  { %v2186_v5 = vpack.c.bf16 %v88_v59, %v87_v58  ;;  %v2189_v6 = vpack.c.bf16 %v106_v62, %v105_v60  ;;  %v1078_v9 = vld [vmem:[%s4610_s3 + $0x260] sm:$0xff]  ;;  %v1080_v10 = vld [vmem:[%s4610_s3 + $0x270] sm:$0xff]  ;;  %v1083_v11 = vld [vmem:[%s4610_s3 + $0x288] sm:$0xff] }
  0x1e   :  { %2104 = vmatpush3.bf16.xpose.msk.msra.mxu0 %vm2607_vm1, %v2102_v52  ;;  %v2911_v52 = vpack.c.bf16 %v1068_v47, %v1066_v46  ;;  %v1085_v12 = vld [vmem:[%s4610_s3 + $0x298] sm:$0xff]  ;;  %v1082_v19 = vld [vmem:[%s4610_s3 + $0x280] sm:$0xff]  ;;  %v1084_v20 = vld [vmem:[%s4610_s3 + $0x290] sm:$0xff] }
  0x1f   :  { %2152 = vmatpush3.bf16.xpose.msk.msra.mxu1 %vm2607_vm1, %v2150_v53  ;;  %2107 = vmatprep.subr.msk.bf16.mxu0 %vm2607_vm1, %v2105_v54  ;;  %v2913_v53 = vpack.c.bf16 %v1073_v49, %v1071_v48  ;;  %v1070_v54 = vld [vmem:[%s4610_s3 + $0x220] sm:$0xff]  ;;  %v108_v17 = vld [vmem:[%s4608_s1 + $0x2b8] sm:$0xff]  ;;  %v3005_v18 = vpack.c.bf16 %v1085_v12, %v1083_v11  ;;  %v1087_v21 = vld [vmem:[%s4610_s3 + $0x2a8] sm:$0xff] }
  0x20   :  { %2155 = vmatprep.subr.msk.bf16.mxu1 %vm2607_vm1, %v2153_v55  ;;  %v1072_v55 = vld [vmem:[%s4610_s3 + $0x230] sm:$0xff]  ;;  %v1089_v22 = vld [vmem:[%s4610_s3 + $0x2b8] sm:$0xff]  ;;  %v1091_v29 = vld [vmem:[%s4610_s3 + $0x2c8] sm:$0xff] }
  0x21   :  { %v2947_v61 = vpack.c.bf16 %v1072_v55, %v1070_v54  ;;  %v1093_v30 = vld [vmem:[%s4610_s3 + $0x2d8] sm:$0xff]  ;;  %v91_v31 = vld [vmem:[%s4608_s1 + $0x230] sm:$0xff]  ;;  %v109_v33 = vld [vmem:[%s4608_s1 + $0x2c0] sm:$0xff] }
  0x22   :  { %v92_v32 = vld [vmem:[%s4608_s1 + $0x238] sm:$0xff]  ;;  %v110_v35 = vld [vmem:[%s4608_s1 + $0x2c8] sm:$0xff]  ;;  %v3057_v36 = vpack.c.bf16 %v1093_v30, %v1091_v29  ;;  %v1094_v47 = vld [vmem:[%s4610_s3 + $0x2e0] sm:$0xff] }
  0x23   :  { %v1097_v41 = vld [vmem:[%s4610_s3 + $0x2f8] sm:$0xff]  ;;  %v2198_v42 = vpack.c.bf16 %v92_v32, %v91_v31  ;;  %v2201_v43 = vpack.c.bf16 %v110_v35, %v109_v33  ;;  %v1096_v48 = vld [vmem:[%s4610_s3 + $0x2f0] sm:$0xff]  ;;  %v93_v49 = vld [vmem:[%s4608_s1 + $0x240] sm:$0xff] }
  0x24   :  { %v111_v54 = vld [vmem:[%s4608_s1 + $0x2d0] sm:$0xff]  ;;  %v112_v55 = vld [vmem:[%s4608_s1 + $0x2d8] sm:$0xff]  ;;  %v113_v60 = vld [vmem:[%s4608_s1 + $0x2e0] sm:$0xff] }
  0x25   :  { %v2207_v57 = vpack.c.bf16 %v112_v55, %v111_v54  ;;  %v95_v58 = vld [vmem:[%s4608_s1 + $0x250] sm:$0xff]  ;;  %v96_v59 = vld [vmem:[%s4608_s1 + $0x258] sm:$0xff]  ;;  %v114_v62 = vld [vmem:[%s4608_s1 + $0x2e8] sm:$0xff] }
  0x26   :  { %2110 = vmatpush3.bf16.xpose.msk.msra.mxu0 %vm2607_vm1, %v2108_v0  ;;  %v1074_v0 = vld [vmem:[%s4610_s3 + $0x240] sm:$0xff]  ;;  %v99_v11 = vld [vmem:[%s4608_s1 + $0x270] sm:$0xff]  ;;  %v100_v12 = vld [vmem:[%s4608_s1 + $0x278] sm:$0xff] }
  0x27   :  { %2158 = vmatpush3.bf16.xpose.msk.msra.mxu1 %vm2607_vm1, %v2156_v1  ;;  %2113 = vmatprep.subr.msk.bf16.mxu0 %vm2607_vm1, %v2111_v3  ;;  %v1076_v1 = vld [vmem:[%s4610_s3 + $0x250] sm:$0xff]  ;;  %v1079_v3 = vld [vmem:[%s4610_s3 + $0x268] sm:$0xff]  ;;  %v1013_v29 = vld [vmem:[%s4610_s3 + $0x58] sm:$0xff] }
  0x28   :  { %2161 = vmatprep.subr.msk.bf16.mxu1 %vm2607_vm1, %v2159_v4  ;;  %v1081_v4 = vld [vmem:[%s4610_s3 + $0x278] sm:$0xff]  ;;  %v2968_v7 = vpack.c.bf16 %v1076_v1, %v1074_v0  ;;  %v2210_v0 = vpack.c.bf16 %v96_v59, %v95_v58  ;;  %v2213_v1 = vpack.c.bf16 %v114_v62, %v113_v60  ;;  %v1010_v32 = vld [vmem:[%s4610_s3 + $0x40] sm:$0xff]  ;;  %v1012_v33 = vld [vmem:[%s4610_s3 + $0x50] sm:$0xff] }
  0x29   :  { %v2971_v8 = vpack.c.bf16 %v1081_v4, %v1079_v3  ;;  %v97_v3 = vld [vmem:[%s4608_s1 + $0x260] sm:$0xff]  ;;  %v98_v4 = vld [vmem:[%s4608_s1 + $0x268] sm:$0xff]  ;;  %v1025_v55 = vld [vmem:[%s4610_s3 + $0xb8] sm:$0xff] }
  0x2a   :  { %v1015_v35 = vld [vmem:[%s4610_s3 + $0x68] sm:$0xff]  ;;  %v1022_v58 = vld [vmem:[%s4610_s3 + $0xa0] sm:$0xff]  ;;  %v1024_v59 = vld [vmem:[%s4610_s3 + $0xb0] sm:$0xff] }
  0x2b   :  { %v1023_v54 = vld [vmem:[%s4610_s3 + $0xa8] sm:$0xff]  ;;  %v1029_v62 = vld [vmem:[%s4610_s3 + $0xd8] sm:$0xff] }
  0x2c   :  { %v1027_v60 = vld [vmem:[%s4610_s3 + $0xc8] sm:$0xff] }
  0x2e   :  { %2116 = vmatpush3.bf16.xpose.msk.msra.mxu0 %vm2607_vm1, %v2114_v13  ;;  %v89_v13 = vld [vmem:[%s4608_s1 + $0x220] sm:$0xff] }
  0x2f   :  { %2164 = vmatpush3.bf16.xpose.msk.msra.mxu1 %vm2607_vm1, %v2162_v14  ;;  %2119 = vmatprep.subr.msk.bf16.mxu0 %vm2607_vm1, %v2117_v15  ;;  %v90_v14 = vld [vmem:[%s4608_s1 + $0x228] sm:$0xff]  ;;  %v107_v15 = vld [vmem:[%s4608_s1 + $0x2b0] sm:$0xff] }
  0x30   :  { %2167 = vmatprep.subr.msk.bf16.mxu1 %vm2607_vm1, %v2165_v16  ;;  %v2999_v16 = vpack.c.bf16 %v1080_v10, %v1078_v9  ;;  %v2192_v23 = vpack.c.bf16 %v90_v14, %v89_v13  ;;  %v2195_v24 = vpack.c.bf16 %v108_v17, %v107_v15  ;;  %v2216_v9 = vpack.c.bf16 %v98_v4, %v97_v3  ;;  %v1003_v13 = vld [vmem:[%s4610_s3 + $0x8] sm:$0xff]  ;;  %v1005_v14 = vld [vmem:[%s4610_s3 + $0x18] sm:$0xff]  ;;  %v1026_v3 = vld [vmem:[%s4610_s3 + $0xc0] sm:$0xff] }
  0x31   :  { %v2222_v15 = vpack.c.bf16 %v100_v12, %v99_v11  ;;  %v2225_v17 = vpack.c.bf16 %v1005_v14, %v1003_v13  ;;  %v1028_v4 = vld [vmem:[%s4610_s3 + $0xd0] sm:$0xff]  ;;  %v1099_v11 = vld [vmem:[%s4610_s3 + $0x308] sm:$0xff]  ;;  %v1101_v12 = vld [vmem:[%s4610_s3 + $0x318] sm:$0xff] }
  0x32   :  { %v1032_v14 = vld [vmem:[%s4610_s3 + $0xf0] sm:$0xff] }
  0x36   :  { %2122 = vmatpush3.bf16.xpose.msk.msra.mxu0 %vm2607_vm1, %v2120_v25  ;;  %v3020_v25 = vpack.c.bf16 %v1084_v20, %v1082_v19  ;;  %v1002_v19 = vld [vmem:[%s4610_s3] sm:$0xff]  ;;  %v1004_v20 = vld [vmem:[%s4610_s3 + $0x10] sm:$0xff] }
  0x37   :  { %2170 = vmatpush3.bf16.xpose.msk.msra.mxu1 %vm2607_vm1, %v2168_v26  ;;  %2125 = vmatprep.subr.msk.bf16.mxu0 %vm2607_vm1, %v2123_v27  ;;  %v3023_v26 = vpack.c.bf16 %v1089_v22, %v1087_v21  ;;  %v1086_v27 = vld [vmem:[%s4610_s3 + $0x2a0] sm:$0xff]  ;;  %v1007_v21 = vld [vmem:[%s4610_s3 + $0x28] sm:$0xff]  ;;  %v1009_v22 = vld [vmem:[%s4610_s3 + $0x38] sm:$0xff] }
  0x38   :  { %2173 = vmatprep.subr.msk.bf16.mxu1 %vm2607_vm1, %v2171_v28  ;;  %v1088_v28 = vld [vmem:[%s4610_s3 + $0x2b0] sm:$0xff]  ;;  %v2229_v2 = vpack.c.bf16 %v1009_v22, %v1007_v21  ;;  %v1037_v21 = vld [vmem:[%s4610_s3 + $0x118] sm:$0xff] }
  0x39   :  { %v3051_v34 = vpack.c.bf16 %v1088_v28, %v1086_v27  ;;  %v1008_v27 = vld [vmem:[%s4610_s3 + $0x30] sm:$0xff]  ;;  %v1011_v28 = vld [vmem:[%s4610_s3 + $0x48] sm:$0xff] }
  0x3a   :  { %v2233_v31 = vpack.c.bf16 %v1013_v29, %v1011_v28  ;;  %v1036_v29 = vld [vmem:[%s4610_s3 + $0x110] sm:$0xff] }
  0x3e   :  { %2128 = vmatpush3.bf16.xpose.msk.msra.mxu0 %vm2607_vm1, %v2126_v37  ;;  %v1090_v37 = vld [vmem:[%s4610_s3 + $0x2c0] sm:$0xff] }
  0x3f   :  { %2176 = vmatpush3.bf16.xpose.msk.msra.mxu1 %vm2607_vm1, %v2174_v38  ;;  %2179 = vmatprep.subr.msk.bf16.mxu0 %vm2607_vm1, %v2177_v39  ;;  %v1092_v38 = vld [vmem:[%s4610_s3 + $0x2d0] sm:$0xff]  ;;  %v1095_v39 = vld [vmem:[%s4610_s3 + $0x2e8] sm:$0xff] }
  0x40   :  { %2417 = vmatprep.subr.bf16.mxu1 %v2878_v40  ;;  %v3072_v44 = vpack.c.bf16 %v1092_v38, %v1090_v37  ;;  %v3075_v46 = vpack.c.bf16 %v1097_v41, %v1095_v39  ;;  %v2235_v37 = vpack.c.bf16 %v1012_v33, %v1010_v32  ;;  %v1014_v39 = vld [vmem:[%s4610_s3 + $0x60] sm:$0xff]  ;;  %v1016_v41 = vld [vmem:[%s4610_s3 + $0x70] sm:$0xff]  ;;  %v1039_v33 = vld [vmem:[%s4610_s3 + $0x128] sm:$0xff] }
  0x41   :  { %v1104_v32 = vld [vmem:[%s4610_s3 + $0x330] sm:$0xff] }
  0x45   :  { %2012 = vmatmul.mubr.msk.f32.vlgmr.msra.gmra.mrb[0].mxu0 %vm149_vm0, %v2722_v45 }
  0x46   :  { %2046 = vmatmul.mubr.msk.f32.vlgmr.msra.gmra.mrb[0].mxu1 %vm149_vm0, %v2722_v45  ;;  %2182 = vmatpush3.bf16.xpose.msk.msra.mxu0 %vm2607_vm1, %v2180_v50  ;;  %v94_v50 = vld [vmem:[%s4608_s1 + $0x248] sm:$0xff] }
  0x47   :  { %2079 = vmatprep.mubr.msk.f32.mxu0 %vm149_vm0, %v2722_v45  ;;  %2185 = vmatprep.subr.msk.bf16.mxu0 %vm2607_vm1, %v2183_v51  ;;  %v3094_v51 = vpack.c.bf16 %v1096_v48, %v1094_v47  ;;  %v2204_v56 = vpack.c.bf16 %v94_v50, %v93_v49  ;;  %v2239_v47 = vpack.c.bf16 %v1016_v41, %v1014_v39  ;;  %v1018_v49 = vld [vmem:[%s4610_s3 + $0x80] sm:$0xff]  ;;  %v1020_v50 = vld [vmem:[%s4610_s3 + $0x90] sm:$0xff]  ;;  %v1107_v39 = vld [vmem:[%s4610_s3 + $0x348] sm:$0xff] }
  0x48   :  { %2433 = vmatpush1.bf16.msra.mxu1 %v2911_v52  ;;  %v1109_v41 = vld [vmem:[%s4610_s3 + $0x358] sm:$0xff] }
  0x49   :  { %2418 = vmatprep.subr.bf16.mxu1 %v2913_v53 }
  0x4c   :  { %2434 = vmatpush1.bf16.msra.mxu1 %v2947_v61 }
  0x4d   :  { %2419 = vmatprep.subr.bf16.mxu1 %v2953_v63 }
  0x4e   :  { %2188 = vmatpush3.bf16.xpose.msk.msra.mxu0 %vm2607_vm1, %v2186_v5  ;;  %v115_v5 = vld [vmem:[%s4608_s1 + $0x2f0] sm:$0xff] }
  0x4f   :  { %2191 = vmatprep.subr.msk.bf16.mxu0 %vm2607_vm1, %v2189_v6  ;;  %v116_v6 = vld [vmem:[%s4608_s1 + $0x2f8] sm:$0xff] }
  0x50   :  { %2435 = vmatpush1.bf16.msra.mxu1 %v2968_v7  ;;  %v2219_v10 = vpack.c.bf16 %v116_v6, %v115_v5  ;;  %v1031_v5 = vld [vmem:[%s4610_s3 + $0xe8] sm:$0xff]  ;;  %v1033_v6 = vld [vmem:[%s4610_s3 + $0xf8] sm:$0xff] }
  0x51   :  { %2420 = vmatprep.subr.bf16.mxu1 %v2971_v8  ;;  %v2253_v13 = vpack.c.bf16 %v1033_v6, %v1031_v5  ;;  %v1049_v5 = vld [vmem:[%s4610_s3 + $0x178] sm:$0xff] }
  0x54   :  { %2436 = vmatpush1.bf16.msra.mxu1 %v2999_v16 }
  0x55   :  { %2421 = vmatprep.subr.bf16.mxu1 %v3005_v18 }
  0x56   :  { %2194 = vmatpush3.bf16.xpose.msk.msra.mxu0 %vm2607_vm1, %v2192_v23  ;;  %v2227_v23 = vpack.c.bf16 %v1004_v20, %v1002_v19  ;;  %v1100_v19 = vld [vmem:[%s4610_s3 + $0x310] sm:$0xff]  ;;  %v1035_v20 = vld [vmem:[%s4610_s3 + $0x108] sm:$0xff] }
  0x57   :  { %2197 = vmatprep.subr.msk.bf16.mxu0 %vm2607_vm1, %v2195_v24  ;;  %v1006_v24 = vld [vmem:[%s4610_s3 + $0x20] sm:$0xff]  ;;  %v2257_v28 = vpack.c.bf16 %v1037_v21, %v1035_v20  ;;  %v1116_v20 = vld [vmem:[%s4610_s3 + $0x390] sm:$0xff]  ;;  %v1051_v21 = vld [vmem:[%s4610_s3 + $0x188] sm:$0xff] }
  0x58   :  { %2437 = vmatpush1.bf16.msra.mxu1 %v3020_v25  ;;  %v2231_v30 = vpack.c.bf16 %v1008_v27, %v1006_v24  ;;  %v1103_v24 = vld [vmem:[%s4610_s3 + $0x328] sm:$0xff]  ;;  %v1105_v27 = vld [vmem:[%s4610_s3 + $0x338] sm:$0xff] }
  0x59   :  { %2422 = vmatprep.subr.bf16.mxu1 %v3023_v26 }
  0x5c   :  { %2438 = vmatpush1.bf16.msra.mxu1 %v3051_v34 }
  0x5d   :  { %2423 = vmatprep.subr.bf16.mxu1 %v3057_v36 }
  0x5e   :  { %2200 = vmatpush3.bf16.xpose.msk.msra.mxu0 %vm2607_vm1, %v2198_v42  ;;  %v1019_v42 = vld [vmem:[%s4610_s3 + $0x88] sm:$0xff] }
  0x5f   :  { %2203 = vmatprep.subr.msk.bf16.mxu0 %vm2607_vm1, %v2201_v43  ;;  %v1021_v43 = vld [vmem:[%s4610_s3 + $0x98] sm:$0xff] }
  0x60   :  { %2439 = vmatpush1.bf16.msra.mxu1 %v3072_v44  ;;  %v2241_v48 = vpack.c.bf16 %v1021_v43, %v1019_v42  ;;  %v1040_v43 = vld [vmem:[%s4610_s3 + $0x130] sm:$0xff] }
  0x61   :  { %2424 = vmatprep.subr.bf16.mxu1 %v3075_v46 }
  0x64   :  { %2440 = vmatpush1.bf16.msra.mxu1 %v3094_v51 }
  0x66   :  { %2206 = vmatpush3.bf16.xpose.msk.msra.mxu0 %vm2607_vm1, %v2204_v56  ;;  %v2243_v56 = vpack.c.bf16 %v1020_v50, %v1018_v49  ;;  %v1108_v49 = vld [vmem:[%s4610_s3 + $0x350] sm:$0xff]  ;;  %v1043_v50 = vld [vmem:[%s4610_s3 + $0x148] sm:$0xff] }
  0x67   :  { %2209 = vmatprep.subr.msk.bf16.mxu0 %vm2607_vm1, %v2207_v57  ;;  %v2245_v57 = vpack.c.bf16 %v1025_v55, %v1023_v54  ;;  %v1045_v54 = vld [vmem:[%s4610_s3 + $0x158] sm:$0xff] }
  0x6e   :  { %2212 = vmatpush3.bf16.xpose.msk.msra.mxu0 %vm2607_vm1, %v2210_v0  ;;  %v2247_v0 = vpack.c.bf16 %v1024_v59, %v1022_v58  ;;  %v1111_v58 = vld [vmem:[%s4610_s3 + $0x368] sm:$0xff]  ;;  %v1113_v59 = vld [vmem:[%s4610_s3 + $0x378] sm:$0xff] }
  0x6f   :  { %2215 = vmatprep.subr.msk.bf16.mxu0 %vm2607_vm1, %v2213_v1  ;;  %v2249_v1 = vpack.c.bf16 %v1029_v62, %v1027_v60  ;;  %v2265_v60 = vpack.c.bf16 %v1045_v54, %v1043_v50  ;;  %v1044_v62 = vld [vmem:[%s4610_s3 + $0x150] sm:$0xff] }
  0x70   :  { %v1056_v54 = vld [vmem:[%s4610_s3 + $0x1b0] sm:$0xff] }
  0x76   :  { %2218 = vmatpush3.bf16.xpose.msk.msra.mxu0 %vm2607_vm1, %v2216_v9  ;;  %v2251_v9 = vpack.c.bf16 %v1028_v4, %v1026_v3  ;;  %v1112_v3 = vld [vmem:[%s4610_s3 + $0x370] sm:$0xff]  ;;  %v1047_v4 = vld [vmem:[%s4610_s3 + $0x168] sm:$0xff] }
  0x77   :  { %2221 = vmatprep.subr.msk.bf16.mxu0 %vm2607_vm1, %v2219_v10  ;;  %v1030_v10 = vld [vmem:[%s4610_s3 + $0xe0] sm:$0xff] }
  0x7e   :  { %2224 = vmatpush3.bf16.xpose.msk.msra.mxu0 %vm2607_vm1, %v2222_v15  ;;  %v3252_v15 = vpack.c.bf16 %v1101_v12, %v1099_v11  ;;  %v1115_v11 = vld [vmem:[%s4610_s3 + $0x388] sm:$0xff]  ;;  %v1117_v12 = vld [vmem:[%s4610_s3 + $0x398] sm:$0xff] }
  0x7f   :  { %2226 = vmatprep.subr.bf16.mxu0 %v2225_v17  ;;  %v1098_v17 = vld [vmem:[%s4610_s3 + $0x300] sm:$0xff] }
  0x80   :  { %v3266_v22 = vpack.c.bf16 %v1100_v19, %v1098_v17  ;;  %2425 = vmatprep.subr.bf16.mxu1 %v3252_v15  ;;  %v3372_v17 = vpack.c.bf16 %v1117_v12, %v1115_v11  ;;  %v1114_v19 = vld [vmem:[%s4610_s3 + $0x380] sm:$0xff] }
  0x81   :  { %v1126_v12 = vld [vmem:[%s4610_s3 + $0x3e0] sm:$0xff] }
  0x82   :  { %2441 = vmatpush1.bf16.msra.mxu1 %v3266_v22 }
  0x85   :  { %2080 = vmatmul.mubr.msk.f32.vlgmr.msra.gmra.mrb[2].mxu0 %vm149_vm0, %v2722_v45  ;;  %v1017_v45 = vld [vmem:[%s4610_s3 + $0x78] sm:$0xff] }
  0x86   :  { %2228 = vmatpush1.bf16.msra.mxu0 %v2227_v23  ;;  %v2237_v38 = vpack.c.bf16 %v1017_v45, %v1015_v35  ;;  %v2255_v23 = vpack.c.bf16 %v1032_v14, %v1030_v10  ;;  %v1041_v35 = vld [vmem:[%s4610_s3 + $0x138] sm:$0xff]  ;;  %v1046_v10 = vld [vmem:[%s4610_s3 + $0x160] sm:$0xff]  ;;  %v1048_v14 = vld [vmem:[%s4610_s3 + $0x170] sm:$0xff] }
  0x87   :  { %2230 = vmatprep.subr.bf16.mxu0 %v2229_v2  ;;  %v1034_v2 = vld [vmem:[%s4610_s3 + $0x100] sm:$0xff]  ;;  %v2261_v42 = vpack.c.bf16 %v1041_v35, %v1039_v33 }
  0x88   :  { %v1118_v35 = vld [vmem:[%s4610_s3 + $0x3a0] sm:$0xff] }
  0x8a   :  { %2232 = vmatpush1.bf16.msra.mxu0 %v2231_v30  ;;  %v3282_v30 = vpack.c.bf16 %v1105_v27, %v1103_v24  ;;  %v2271_v24 = vpack.c.bf16 %v1048_v14, %v1046_v10  ;;  %v1050_v27 = vld [vmem:[%s4610_s3 + $0x180] sm:$0xff]  ;;  %v1060_v10 = vld [vmem:[%s4610_s3 + $0x1d0] sm:$0xff]  ;;  %v1063_v14 = vld [vmem:[%s4610_s3 + $0x1e8] sm:$0xff] }
  0x8b   :  { %2234 = vmatprep.subr.bf16.mxu0 %v2233_v31  ;;  %v1102_v31 = vld [vmem:[%s4610_s3 + $0x320] sm:$0xff] }
  0x8c   :  { %v3296_v45 = vpack.c.bf16 %v1104_v32, %v1102_v31  ;;  %2426 = vmatprep.subr.bf16.mxu1 %v3282_v30  ;;  %v1052_v32 = vld [vmem:[%s4610_s3 + $0x190] sm:$0xff] }
  0x8e   :  { %2236 = vmatpush1.bf16.msra.mxu0 %v2235_v37  ;;  %v2259_v37 = vpack.c.bf16 %v1036_v29, %v1034_v2  ;;  %2442 = vmatpush1.bf16.msra.mxu1 %v3296_v45  ;;  %v3386_v2 = vpack.c.bf16 %v1116_v20, %v1114_v19  ;;  %v1121_v29 = vld [vmem:[%s4610_s3 + $0x3b8] sm:$0xff] }
  0x8f   :  { %2238 = vmatprep.subr.bf16.mxu0 %v2237_v38  ;;  %v1038_v38 = vld [vmem:[%s4610_s3 + $0x120] sm:$0xff]  ;;  %v1065_v19 = vld [vmem:[%s4610_s3 + $0x1f8] sm:$0xff] }
  0x92   :  { %2240 = vmatpush1.bf16.msra.mxu0 %v2239_v47  ;;  %v3312_v47 = vpack.c.bf16 %v1109_v41, %v1107_v39  ;;  %v1057_v39 = vld [vmem:[%s4610_s3 + $0x1b8] sm:$0xff] }
  0x93   :  { %2242 = vmatprep.subr.bf16.mxu0 %v2241_v48  ;;  %v1106_v48 = vld [vmem:[%s4610_s3 + $0x340] sm:$0xff] }
  0x94   :  { %v3326_v55 = vpack.c.bf16 %v1108_v49, %v1106_v48  ;;  %2427 = vmatprep.subr.bf16.mxu1 %v3312_v47  ;;  %v1123_v48 = vld [vmem:[%s4610_s3 + $0x3c8] sm:$0xff]  ;;  %v1125_v49 = vld [vmem:[%s4610_s3 + $0x3d8] sm:$0xff] }
  0x96   :  { %2244 = vmatpush1.bf16.msra.mxu0 %v2243_v56  ;;  %v2263_v56 = vpack.c.bf16 %v1040_v43, %v1038_v38  ;;  %2443 = vmatpush1.bf16.msra.mxu1 %v3326_v55  ;;  %v1055_v38 = vld [vmem:[%s4610_s3 + $0x1a8] sm:$0xff]  ;;  %v1054_v43 = vld [vmem:[%s4610_s3 + $0x1a0] sm:$0xff] }
  0x97   :  { %2246 = vmatprep.subr.bf16.mxu0 %v2245_v57  ;;  %v1042_v57 = vld [vmem:[%s4610_s3 + $0x140] sm:$0xff]  ;;  %v2277_v50 = vpack.c.bf16 %v1057_v39, %v1055_v38 }
  0x9a   :  { %2248 = vmatpush1.bf16.msra.mxu0 %v2247_v0  ;;  %v3342_v0 = vpack.c.bf16 %v1113_v59, %v1111_v58  ;;  %v1124_v58 = vld [vmem:[%s4610_s3 + $0x3d0] sm:$0xff]  ;;  %v1059_v59 = vld [vmem:[%s4610_s3 + $0x1c8] sm:$0xff] }
  0x9b   :  { %2250 = vmatprep.subr.bf16.mxu0 %v2249_v1  ;;  %v1110_v1 = vld [vmem:[%s4610_s3 + $0x360] sm:$0xff] }
  0x9c   :  { %v3356_v6 = vpack.c.bf16 %v1112_v3, %v1110_v1  ;;  %2428 = vmatprep.subr.bf16.mxu1 %v3342_v0  ;;  %v2279_v1 = vpack.c.bf16 %v1056_v54, %v1054_v43  ;;  %v1058_v3 = vld [vmem:[%s4610_s3 + $0x1c0] sm:$0xff] }
  0x9e   :  { %2252 = vmatpush1.bf16.msra.mxu0 %v2251_v9  ;;  %v2267_v9 = vpack.c.bf16 %v1044_v62, %v1042_v57  ;;  %2444 = vmatpush1.bf16.msra.mxu1 %v3356_v6  ;;  %v1122_v57 = vld [vmem:[%s4610_s3 + $0x3c0] sm:$0xff] }
  0x9f   :  { %2254 = vmatprep.subr.bf16.mxu0 %v2253_v13  ;;  %v2269_v13 = vpack.c.bf16 %v1049_v5, %v1047_v4  ;;  %2429 = vmatprep.subr.bf16.mxu1 %v3372_v17  ;;  %v3446_v62 = vpack.c.bf16 %v1124_v58, %v1122_v57  ;;  %v1127_v4 = vld [vmem:[%s4610_s3 + $0x3e8] sm:$0xff]  ;;  %v1129_v5 = vld [vmem:[%s4610_s3 + $0x3f8] sm:$0xff] }
  0xa0   :  { %v3462_v11 = vpack.c.bf16 %v1129_v5, %v1127_v4 }
  0xa2   :  { %2256 = vmatpush1.bf16.msra.mxu0 %v2255_v23  ;;  %v1053_v23 = vld [vmem:[%s4610_s3 + $0x198] sm:$0xff]  ;;  %2445 = vmatpush1.bf16.msra.mxu1 %v3386_v2 }
  0xa3   :  { %2258 = vmatprep.subr.bf16.mxu0 %v2257_v28  ;;  %v1119_v28 = vld [vmem:[%s4610_s3 + $0x3a8] sm:$0xff]  ;;  %v2273_v31 = vpack.c.bf16 %v1053_v23, %v1051_v21  ;;  %v2283_v21 = vpack.c.bf16 %v1060_v10, %v1058_v3  ;;  %v2285_v23 = vpack.c.bf16 %v1065_v19, %v1063_v14 }
  0xa4   :  { %v3402_v33 = vpack.c.bf16 %v1121_v29, %v1119_v28  ;;  %v1131_v28 = vld [vmem:[%s4610_s3 + $0x408] sm:$0xff]  ;;  %v1133_v29 = vld [vmem:[%s4610_s3 + $0x418] sm:$0xff] }
  0xa6   :  { %2260 = vmatpush1.bf16.msra.mxu0 %v2259_v37  ;;  %v1120_v37 = vld [vmem:[%s4610_s3 + $0x3b0] sm:$0xff]  ;;  %2430 = vmatprep.subr.bf16.mxu1 %v3402_v33 }
  0xa7   :  { %2262 = vmatprep.subr.bf16.mxu0 %v2261_v42  ;;  %v3416_v41 = vpack.c.bf16 %v1120_v37, %v1118_v35  ;;  %v2275_v42 = vpack.c.bf16 %v1052_v32, %v1050_v27  ;;  %v1064_v27 = vld [vmem:[%s4610_s3 + $0x1f0] sm:$0xff]  ;;  %v119_v35 = vlaneseq }
  0xa9   :  { %2446 = vmatpush1.bf16.msra.mxu1 %v3416_v41  ;;  %v3493_v37 = vshrl.u32 %v119_v35, 7 }
  0xaa   :  { %2264 = vmatpush1.bf16.msra.mxu0 %v2263_v56  ;;  %v3432_v56 = vpack.c.bf16 %v1125_v49, %v1123_v48 }
  0xab   :  { %2266 = vmatprep.subr.bf16.mxu0 %v2265_v60  ;;  %v1061_v60 = vld [vmem:[%s4610_s3 + $0x1d8] sm:$0xff]  ;;  %v3496_v38 = vsub.s32 0, %v3493_v37  ;;  %v129_v39 = vsub.s32 2, %v3493_v37  ;;  %v125_v43 = vsub.s32 1, %v3493_v37  ;;  %v133_v48 = vsub.s32 3, %v3493_v37 }
  0xac   :  { %2431 = vmatprep.subr.bf16.mxu1 %v3432_v56 }
  0xad   :  { %2447 = vmatpush1.bf16.msra.mxu1 %v3446_v62 }
  0xae   :  { %2268 = vmatpush1.bf16.msra.mxu0 %v2267_v9  ;;  %v2281_v9 = vpack.c.bf16 %v1061_v60, %v1059_v59  ;;  %2432 = vmatprep.subr.bf16.mxu1 %v3462_v11 }
  0xaf   :  { %2270 = vmatprep.subr.bf16.mxu0 %v2269_v13  ;;  %v1128_v13 = vld [vmem:[%s4610_s3 + $0x3f0] sm:$0xff] }
  0xb0   :  { %v3476_v20 = vpack.c.bf16 %v1128_v13, %v1126_v12 }
  0xb2   :  { %2272 = vmatpush1.bf16.msra.mxu0 %v2271_v24  ;;  %2448 = vmatpush1.bf16.msra.mxu1 %v3476_v20  ;;  %v1062_v24 = vld [vmem:[%s4610_s3 + $0x1e0] sm:$0xff] }
  0xb3   :  { %2274 = vmatprep.subr.bf16.mxu0 %v2273_v31  ;;  %v2353_v31 = vpack.c.bf16 %v1133_v29, %v1131_v28  ;;  %v2287_v32 = vpack.c.bf16 %v1064_v27, %v1062_v24 }
  0xb5   :  { %2354 = vmatprep.subr.bf16.mxu1 %v2353_v31 }
  0xb6   :  { %2276 = vmatpush1.bf16.msra.mxu0 %v2275_v42  ;;  %v3502_v42 = vld [vmem:[%s4611_s2] sm:$0x3f] }
  0xb7   :  { %2278 = vmatprep.subr.bf16.mxu0 %v2277_v50  ;;  %v130_v49 = vrot.slane %v3502_v42, %v129_v39  ;;  %v126_v50 = vrot.slane %v3502_v42, %v125_v43  ;;  %v134_v54 = vrot.slane %v3502_v42, %v133_v48  ;;  %v690_v39 = vld [vmem:[%s4612_s4] sm:$0xff]  ;;  %v691_v48 = vld [vmem:[%s4612_s4 + $0x8] sm:$0xff] }
  0xba   :  { %2280 = vmatpush1.bf16.msra.mxu0 %v2279_v1 }
  0xbb   :  { %2282 = vmatprep.subr.bf16.mxu0 %v2281_v9 }
  0xbe   :  { %2284 = vmatpush1.bf16.msra.mxu0 %v2283_v21 }
  0xbf   :  { %2286 = vmatprep.subr.bf16.mxu0 %v2285_v23 }
  0xc2   :  { %2288 = vmatpush1.bf16.msra.mxu0 %v2287_v32 }
  0xc3   :  { %2290 = vmatprep.subr.bf16.mxu0 %v2878_v40  ;;  %v122_v40 = vrot.slane %v3502_v42, %v3496_v38 }
 0x118   :  { %v507_v57 = vpop.f32.mrb[0].mxu0 }
 0x119   :  { %v578_v58 = vpop.f32.mrb[0].mxu1  ;;  %v508_v59 = vadd.f32 %v507_v57, %v122_v40  ;;  %v509_v1 = vpop.f32.mrb[1].mxu0  ;;  %v697_v40 = vld [vmem:[%s4612_s4 + $0x38] sm:$0xff] }
 0x11a   :  { %v579_v60 = vadd.f32 %v578_v58, %v130_v49  ;;  %v580_v3 = vpop.f32.mrb[1].mxu1  ;;  %v510_v4 = vadd.f32 %v509_v1, %v126_v50  ;;  %v717_v57 = vld [vmem:[%s4612_s4 + $0xd8] sm:$0xff]  ;;  %v1130_v58 = vld [vmem:[%s4610_s3 + $0x400] sm:$0xff] }
 0x11b   :  { %v581_v5 = vadd.f32 %v580_v3, %v134_v54  ;;  %v1973_v9 = vmul.f32 -1.442695, %v508_v59  ;;  %v1132_v59 = vld [vmem:[%s4610_s3 + $0x410] sm:$0xff] }
 0x11c   :  { %v1975_v10 = vmul.f32 -1.442695, %v579_v60  ;;  %v1974_v12 = vmul.f32 -1.442695, %v510_v4  ;;  %v716_v3 = vld [vmem:[%s4612_s4 + $0xd0] sm:$0xff]  ;;  %v1135_v4 = vld [vmem:[%s4610_s3 + $0x428] sm:$0xff] }
 0x11d   :  { %v1976_v13 = vmul.f32 -1.442695, %v581_v5  ;;  %2545 = vpow2.f32 %v1973_v9  ;;  %v1137_v5 = vld [vmem:[%s4610_s3 + $0x438] sm:$0xff] }
 0x11e   :  { %2547 = vpow2.f32 %v1975_v10  ;;  %v723_v10 = vld [vmem:[%s4612_s4 + $0x108] sm:$0xff] }
 0x11f   :  { %2549 = vpow2.f32 %v1974_v12 }
 0x120   :  { %2551 = vpow2.f32 %v1976_v13  ;;  %v696_v13 = vld [vmem:[%s4612_s4 + $0x30] sm:$0xff] }
 0x127   :  { %v2546_v14 = vpop.eup %2545 }
 0x128   :  { %v2548_v19 = vpop.eup %2547  ;;  %v672_v21 = vadd.f32 1.0, %v2546_v14 }
 0x129   :  { %v2550_v23 = vpop.eup %2549  ;;  %v674_v24 = vadd.f32 1.0, %v2548_v19  ;;  %v2355_v19 = vpack.c.bf16 %v1132_v59, %v1130_v58  ;;  %v709_v58 = vld [vmem:[%s4612_s4 + $0x98] sm:$0xff] }
 0x12a   :  { %v2552_v27 = vpop.eup %2551  ;;  %2553 = vrcp.f32 %v672_v21  ;;  %v673_v28 = vadd.f32 1.0, %v2550_v23  ;;  %v703_v21 = vld [vmem:[%s4612_s4 + $0x68] sm:$0xff] }
 0x12b   :  { %2555 = vrcp.f32 %v674_v24  ;;  %v675_v29 = vadd.f32 1.0, %v2552_v27  ;;  %v2357_v24 = vpack.c.bf16 %v1137_v5, %v1135_v4  ;;  %v1134_v27 = vld [vmem:[%s4610_s3 + $0x420] sm:$0xff]  ;;  %v1140_v4 = vld [vmem:[%s4610_s3 + $0x450] sm:$0xff] }
 0x12c   :  { %2557 = vrcp.f32 %v673_v28  ;;  %v1136_v28 = vld [vmem:[%s4610_s3 + $0x430] sm:$0xff] }
 0x12d   :  { %2559 = vrcp.f32 %v675_v29 }
 0x134   :  { %v2554_v31 = vpop.eup %2553 }
 0x135   :  { %v2556_v32 = vpop.eup %2555  ;;  %v3512_v35 = vrot.slane %v2554_v31, %v3496_v38 }
 0x136   :  { %v2558_v43 = vpop.eup %2557  ;;  %v3524_v50 = vrot.slane %v2556_v32, %v3496_v38  ;;  %v722_v32 = vld [vmem:[%s4612_s4 + $0x100] sm:$0xff] }
 0x137   :  { %v2560_v49 = vpop.eup %2559  ;;  %v3527_v54 = vrot.slane %v2558_v43, %v3496_v38  ;;  %v858_v1 = vmul.f32 %v3512_v35, %v690_v39  ;;  %v864_v31 = vmul.f32 %v3512_v35, %v696_v13  ;;  %v1139_v39 = vld [vmem:[%s4610_s3 + $0x448] sm:$0xff]  ;;  %v1141_v43 = vld [vmem:[%s4610_s3 + $0x458] sm:$0xff] }
 0x138   :  { %v3539_v60 = vrot.slane %v2560_v49, %v3496_v38  ;;  %v884_v23 = vmul.f32 %v3524_v50, %v716_v3  ;;  %v702_v49 = vld [vmem:[%s4612_s4 + $0x60] sm:$0xff]  ;;  %v890_v59 = vmul.f32 %v3524_v50, %v722_v32  ;;  %v1145_v13 = vld [vmem:[%s4610_s3 + $0x478] sm:$0xff] }
 0x139   :  { %v859_v9 = vmul.f32 %v3527_v54, %v691_v48  ;;  %v865_v12 = vmul.f32 %v3527_v54, %v697_v40  ;;  %v729_v48 = vld [vmem:[%s4612_s4 + $0x138] sm:$0xff]  ;;  %v871_v40 = vmul.f32 %v3527_v54, %v703_v21  ;;  %v1138_v3 = vld [vmem:[%s4610_s3 + $0x440] sm:$0xff]  ;;  %v708_v21 = vld [vmem:[%s4612_s4 + $0x90] sm:$0xff] }
 0x13a   :  { %v885_v14 = vmul.f32 %v3539_v60, %v717_v57  ;;  %v891_v29 = vmul.f32 %v3539_v60, %v723_v10  ;;  %v2359_v57 = vpack.c.bf16 %v1136_v28, %v1134_v27  ;;  %v897_v5 = vmul.f32 %v3539_v60, %v729_v48  ;;  %v728_v10 = vld [vmem:[%s4612_s4 + $0x130] sm:$0xff]  ;;  %v1147_v48 = vld [vmem:[%s4610_s3 + $0x488] sm:$0xff] }
 0x13b   :  { %1258 = vmatprep.mubr.f32.mxu0 %v859_v9  ;;  %v870_v9 = vmul.f32 %v3512_v35, %v702_v49  ;;  %v896_v27 = vmul.f32 %v3524_v50, %v728_v10  ;;  %v721_v10 = vld [vmem:[%s4612_s4 + $0xf8] sm:$0xff] }
 0x13c   :  { %1491 = vmatprep.mubr.f32.mxu1 %v885_v14  ;;  %1259 = vmatmul.mubr.f32.vlgmr.msra.gmra.mrb[4].mxu0 %v858_v1  ;;  %v2361_v1 = vpack.c.bf16 %v1141_v43, %v1139_v39  ;;  %v735_v14 = vld [vmem:[%s4612_s4 + $0x168] sm:$0xff]  ;;  %v876_v39 = vmul.f32 %v3512_v35, %v708_v21  ;;  %v734_v43 = vld [vmem:[%s4612_s4 + $0x160] sm:$0xff] }
 0x13d   :  { %1492 = vmatmul.mubr.f32.vlgmr.msra.gmra.mrb[2].mxu1 %v884_v23  ;;  %1264 = vmatprep.mubr.f32.mxu0 %v865_v12  ;;  %v1143_v12 = vld [vmem:[%s4610_s3 + $0x468] sm:$0xff]  ;;  %v2363_v23 = vpack.c.bf16 %v1140_v4, %v1138_v3  ;;  %v903_v32 = vmul.f32 %v3539_v60, %v735_v14  ;;  %v1146_v3 = vld [vmem:[%s4610_s3 + $0x480] sm:$0xff]  ;;  %v1148_v4 = vld [vmem:[%s4610_s3 + $0x490] sm:$0xff] }
 0x13e   :  { %2356 = vmatpush1.bf16.msra.mxu1 %v2355_v19  ;;  %1497 = vmatprep.mubr.f32.mxu1 %v891_v29  ;;  %v877_v19 = vmul.f32 %v3527_v54, %v709_v58  ;;  %v2365_v28 = vpack.c.bf16 %v1145_v13, %v1143_v12  ;;  %v1142_v29 = vld [vmem:[%s4610_s3 + $0x460] sm:$0xff]  ;;  %v1151_v12 = vld [vmem:[%s4610_s3 + $0x4a8] sm:$0xff]  ;;  %v1153_v13 = vld [vmem:[%s4610_s3 + $0x4b8] sm:$0xff] }
 0x13f   :  { %2358 = vmatprep.subr.bf16.mxu1 %v2357_v24  ;;  %v715_v24 = vld [vmem:[%s4612_s4 + $0xc8] sm:$0xff]  ;;  %2292 = vmatpush1.bf16.msra.mxu0 %v2911_v52  ;;  %v741_v52 = vld [vmem:[%s4612_s4 + $0x198] sm:$0xff]  ;;  %v746_v14 = vld [vmem:[%s4612_s4 + $0x1c0] sm:$0xff] }
 0x140   :  { %1265 = vmatmul.mubr.f32.gmra.mrb[6].mxu0 %v864_v31  ;;  %v1144_v31 = vld [vmem:[%s4610_s3 + $0x470] sm:$0xff]  ;;  %2294 = vmatprep.subr.bf16.mxu0 %v2913_v53  ;;  %v883_v49 = vmul.f32 %v3527_v54, %v715_v24  ;;  %v2373_v24 = vpack.c.bf16 %v1153_v13, %v1151_v12 }
 0x141   :  { %1498 = vmatmul.mubr.f32.gmra.mrb[4].mxu1 %v890_v59  ;;  %1270 = vmatprep.mubr.f32.mxu0 %v871_v40  ;;  %v1149_v40 = vld [vmem:[%s4610_s3 + $0x498] sm:$0xff]  ;;  %v2367_v58 = vpack.c.bf16 %v1144_v31, %v1142_v29  ;;  %v902_v59 = vmul.f32 %v3524_v50, %v734_v43  ;;  %v740_v53 = vld [vmem:[%s4612_s4 + $0x190] sm:$0xff]  ;;  %v727_v31 = vld [vmem:[%s4612_s4 + $0x128] sm:$0xff] }
 0x142   :  { %1503 = vmatprep.mubr.f32.mxu1 %v897_v5  ;;  %2360 = vmatpush1.bf16.msra.mxu1 %v2359_v57  ;;  %v714_v57 = vld [vmem:[%s4612_s4 + $0xc0] sm:$0xff]  ;;  %v909_v5 = vmul.f32 %v3539_v60, %v741_v52  ;;  %v908_v21 = vmul.f32 %v3524_v50, %v740_v53  ;;  %v914_v52 = vmul.f32 %v3524_v50, %v746_v14 }
 0x143   :  { %2362 = vmatprep.subr.bf16.mxu1 %v2361_v1  ;;  %v2369_v1 = vpack.c.bf16 %v1149_v40, %v1147_v48  ;;  %2296 = vmatpush1.bf16.msra.mxu0 %v2947_v61  ;;  %v747_v61 = vld [vmem:[%s4612_s4 + $0x1c8] sm:$0xff]  ;;  %v752_v48 = vld [vmem:[%s4612_s4 + $0x1f0] sm:$0xff]  ;;  %v1158_v14 = vld [vmem:[%s4610_s3 + $0x4e0] sm:$0xff] }
 0x144   :  { %1271 = vmatmul.mubr.f32.gmra.mrb[8].mxu0 %v870_v9  ;;  %v882_v9 = vmul.f32 %v3512_v35, %v714_v57  ;;  %2298 = vmatprep.subr.bf16.mxu0 %v2953_v63  ;;  %v720_v63 = vld [vmem:[%s4612_s4 + $0xf0] sm:$0xff]  ;;  %v915_v29 = vmul.f32 %v3539_v60, %v747_v61  ;;  %v920_v12 = vmul.f32 %v3524_v50, %v752_v48 }
 0x145   :  { %1504 = vmatmul.mubr.f32.gmra.mrb[6].mxu1 %v896_v27  ;;  %1276 = vmatprep.mubr.f32.mxu0 %v877_v19  ;;  %v2371_v19 = vpack.c.bf16 %v1148_v4, %v1146_v3  ;;  %v1150_v27 = vld [vmem:[%s4610_s3 + $0x4a0] sm:$0xff]  ;;  %v888_v43 = vmul.f32 %v3512_v35, %v720_v63  ;;  %v1159_v3 = vld [vmem:[%s4610_s3 + $0x4e8] sm:$0xff]  ;;  %v1161_v4 = vld [vmem:[%s4610_s3 + $0x4f8] sm:$0xff] }
 0x146   :  { %1509 = vmatprep.mubr.f32.mxu1 %v903_v32  ;;  %2364 = vmatpush1.bf16.msra.mxu1 %v2363_v23  ;;  %v889_v23 = vmul.f32 %v3527_v54, %v721_v10  ;;  %v1155_v32 = vld [vmem:[%s4610_s3 + $0x4c8] sm:$0xff]  ;;  %v2381_v61 = vpack.c.bf16 %v1161_v4, %v1159_v3  ;;  %v1164_v48 = vld [vmem:[%s4610_s3 + $0x510] sm:$0xff]  ;;  %v770_v3 = vld [vmem:[%s4612_s4 + $0x280] sm:$0xff] }
 0x147   :  { %2366 = vmatprep.subr.bf16.mxu1 %v2365_v28  ;;  %v1152_v28 = vld [vmem:[%s4610_s3 + $0x4b0] sm:$0xff]  ;;  %2300 = vmatpush1.bf16.msra.mxu0 %v2968_v7  ;;  %v753_v7 = vld [vmem:[%s4612_s4 + $0x1f8] sm:$0xff]  ;;  %v1163_v63 = vld [vmem:[%s4610_s3 + $0x508] sm:$0xff] }
 0x148   :  { %1277 = vmatmul.mubr.f32.gmra.mrb[10].mxu0 %v876_v39  ;;  %v1157_v39 = vld [vmem:[%s4610_s3 + $0x4d8] sm:$0xff]  ;;  %2302 = vmatprep.subr.bf16.mxu0 %v2971_v8  ;;  %v2375_v40 = vpack.c.bf16 %v1152_v28, %v1150_v27  ;;  %v726_v8 = vld [vmem:[%s4612_s4 + $0x120] sm:$0xff]  ;;  %v921_v53 = vmul.f32 %v3539_v60, %v753_v7  ;;  %v141_v27 = vsub.s32 5, %v3493_v37 }
 0x149   :  { %1510 = vmatmul.mubr.f32.gmra.mrb[8].mxu1 %v902_v59  ;;  %1282 = vmatprep.mubr.f32.mxu0 %v883_v49  ;;  %v895_v49 = vmul.f32 %v3527_v54, %v727_v31  ;;  %v2377_v57 = vpack.c.bf16 %v1157_v39, %v1155_v32  ;;  %v1156_v59 = vld [vmem:[%s4610_s3 + $0x4d0] sm:$0xff] }
 0x14a   :  { %1515 = vmatprep.mubr.f32.mxu1 %v909_v5  ;;  %2368 = vmatpush1.bf16.msra.mxu1 %v2367_v58  ;;  %v1154_v58 = vld [vmem:[%s4610_s3 + $0x4c0] sm:$0xff]  ;;  %v894_v5 = vmul.f32 %v3512_v35, %v726_v8  ;;  %v1167_v8 = vld [vmem:[%s4610_s3 + $0x528] sm:$0xff] }
 0x14b   :  { %2370 = vmatprep.subr.bf16.mxu1 %v2369_v1  ;;  %2304 = vmatpush1.bf16.msra.mxu0 %v2999_v16  ;;  %v733_v1 = vld [vmem:[%s4612_s4 + $0x158] sm:$0xff]  ;;  %v759_v16 = vld [vmem:[%s4612_s4 + $0x228] sm:$0xff]  ;;  %v2379_v10 = vpack.c.bf16 %v1156_v59, %v1154_v58  ;;  %v142_v58 = vrot.slane %v3502_v42, %v141_v27  ;;  %v137_v59 = vsub.s32 4, %v3493_v37  ;;  %v750_v27 = vld [vmem:[%s4612_s4 + $0x1e0] sm:$0xff] }
 0x14c   :  { %1283 = vmatmul.mubr.f32.gmra.mrb[12].mxu0 %v882_v9  ;;  %2306 = vmatprep.subr.bf16.mxu0 %v3005_v18  ;;  %v758_v9 = vld [vmem:[%s4612_s4 + $0x220] sm:$0xff]  ;;  %v901_v13 = vmul.f32 %v3527_v54, %v733_v1  ;;  %v732_v18 = vld [vmem:[%s4612_s4 + $0x150] sm:$0xff] }
 0x14d   :  { %1516 = vmatmul.mubr.f32.gmra.mrb[10].mxu1 %v908_v21  ;;  %1288 = vmatprep.mubr.f32.mxu0 %v889_v23  ;;  %v927_v21 = vmul.f32 %v3539_v60, %v759_v16  ;;  %v739_v23 = vld [vmem:[%s4612_s4 + $0x188] sm:$0xff]  ;;  %v900_v28 = vmul.f32 %v3512_v35, %v732_v18  ;;  %v926_v32 = vmul.f32 %v3524_v50, %v758_v9  ;;  %v1166_v9 = vld [vmem:[%s4610_s3 + $0x520] sm:$0xff] }
 0x14e   :  { %1521 = vmatprep.mubr.f32.mxu1 %v915_v29  ;;  %2372 = vmatpush1.bf16.msra.mxu1 %v2371_v19  ;;  %v1160_v19 = vld [vmem:[%s4610_s3 + $0x4f0] sm:$0xff]  ;;  %v907_v39 = vmul.f32 %v3527_v54, %v739_v23 }
 0x14f   :  { %2374 = vmatprep.subr.bf16.mxu1 %v2373_v24  ;;  %2308 = vmatpush1.bf16.msra.mxu0 %v3020_v25  ;;  %v1165_v24 = vld [vmem:[%s4610_s3 + $0x518] sm:$0xff]  ;;  %v764_v29 = vld [vmem:[%s4612_s4 + $0x250] sm:$0xff]  ;;  %v2383_v31 = vpack.c.bf16 %v1160_v19, %v1158_v14  ;;  %v138_v19 = vrot.slane %v3502_v42, %v137_v59  ;;  %v1170_v42 = vld [vmem:[%s4610_s3 + $0x540] sm:$0xff] }
 0x150   :  { %1289 = vmatmul.mubr.f32.gmra.mrb[14].mxu0 %v888_v43  ;;  %2310 = vmatprep.subr.bf16.mxu0 %v3023_v26  ;;  %v765_v25 = vld [vmem:[%s4612_s4 + $0x258] sm:$0xff]  ;;  %v738_v26 = vld [vmem:[%s4612_s4 + $0x180] sm:$0xff]  ;;  %v2385_v7 = vpack.c.bf16 %v1165_v24, %v1163_v63  ;;  %v776_v23 = vld [vmem:[%s4612_s4 + $0x2b0] sm:$0xff]  ;;  %v938_v24 = vmul.f32 %v3524_v50, %v770_v3 }
 0x151   :  { %1522 = vmatmul.mubr.f32.gmra.mrb[12].mxu1 %v914_v52  ;;  %1294 = vmatprep.mubr.f32.mxu0 %v895_v49  ;;  %v1162_v43 = vld [vmem:[%s4610_s3 + $0x500] sm:$0xff]  ;;  %v745_v52 = vld [vmem:[%s4612_s4 + $0x1b8] sm:$0xff]  ;;  %v906_v1 = vmul.f32 %v3512_v35, %v738_v26  ;;  %v763_v59 = vld [vmem:[%s4612_s4 + $0x248] sm:$0xff] }
 0x152   :  { %1527 = vmatprep.mubr.f32.mxu1 %v921_v53  ;;  %2376 = vmatpush1.bf16.msra.mxu1 %v2375_v40  ;;  %v933_v40 = vmul.f32 %v3539_v60, %v765_v25  ;;  %v2387_v4 = vpack.c.bf16 %v1164_v48, %v1162_v43  ;;  %v913_v16 = vmul.f32 %v3527_v54, %v745_v52  ;;  %v1173_v14 = vld [vmem:[%s4610_s3 + $0x558] sm:$0xff]  ;;  %v782_v48 = vld [vmem:[%s4612_s4 + $0x2e0] sm:$0xff] }
 0x153   :  { %2378 = vmatprep.subr.bf16.mxu1 %v2377_v57  ;;  %2312 = vmatpush1.bf16.msra.mxu0 %v3051_v34  ;;  %v1169_v57 = vld [vmem:[%s4610_s3 + $0x538] sm:$0xff]  ;;  %v771_v34 = vld [vmem:[%s4612_s4 + $0x288] sm:$0xff]  ;;  %v918_v43 = vmul.f32 %v3512_v35, %v750_v27  ;;  %v944_v52 = vmul.f32 %v3524_v50, %v776_v23  ;;  %v1184_v27 = vld [vmem:[%s4610_s3 + $0x5b0] sm:$0xff] }
 0x154   :  { %1295 = vmatmul.mubr.f32.gmra.mrb[16].mxu0 %v894_v5  ;;  %2314 = vmatprep.subr.bf16.mxu0 %v3057_v36  ;;  %v932_v36 = vmul.f32 %v3524_v50, %v764_v29  ;;  %v744_v5 = vld [vmem:[%s4612_s4 + $0x1b0] sm:$0xff]  ;;  %v2389_v37 = vpack.c.bf16 %v1169_v57, %v1167_v8  ;;  %v1177_v26 = vld [vmem:[%s4610_s3 + $0x578] sm:$0xff] }
 0x155   :  { %1528 = vmatmul.mubr.f32.gmra.mrb[14].mxu1 %v920_v12  ;;  %1300 = vmatprep.mubr.f32.mxu0 %v901_v13  ;;  %v939_v12 = vmul.f32 %v3539_v60, %v771_v34  ;;  %v751_v13 = vld [vmem:[%s4612_s4 + $0x1e8] sm:$0xff]  ;;  %v756_v8 = vld [vmem:[%s4612_s4 + $0x210] sm:$0xff]  ;;  %v789_v3 = vld [vmem:[%s4612_s4 + $0x318] sm:$0xff] }
 0x156   :  { %1533 = vmatprep.mubr.f32.mxu1 %v927_v21  ;;  %2380 = vmatpush1.bf16.msra.mxu1 %v2379_v10  ;;  %v1168_v10 = vld [vmem:[%s4610_s3 + $0x530] sm:$0xff]  ;;  %v912_v21 = vmul.f32 %v3512_v35, %v744_v5  ;;  %v950_v5 = vmul.f32 %v3524_v50, %v782_v48  ;;  %v1186_v48 = vld [vmem:[%s4610_s3 + $0x5c0] sm:$0xff] }
 0x157   :  { %2382 = vmatprep.subr.bf16.mxu1 %v2381_v61  ;;  %2316 = vmatpush1.bf16.msra.mxu0 %v3072_v44  ;;  %v1171_v61 = vld [vmem:[%s4610_s3 + $0x548] sm:$0xff]  ;;  %v777_v44 = vld [vmem:[%s4612_s4 + $0x2b8] sm:$0xff]  ;;  %v2391_v63 = vpack.c.bf16 %v1168_v10, %v1166_v9  ;;  %v1178_v10 = vld [vmem:[%s4610_s3 + $0x580] sm:$0xff] }
 0x158   :  { %1301 = vmatmul.mubr.f32.gmra.mrb[18].mxu0 %v900_v28  ;;  %v649_v49 = vpop.f32.mrb[2].mxu0  ;;  %2318 = vmatprep.subr.bf16.mxu0 %v3075_v46  ;;  %v919_v46 = vmul.f32 %v3527_v54, %v751_v13  ;;  %v2393_v25 = vpack.c.bf16 %v1173_v14, %v1171_v61  ;;  %v1172_v28 = vld [vmem:[%s4610_s3 + $0x550] sm:$0xff]  ;;  %v945_v29 = vmul.f32 %v3539_v60, %v777_v44  ;;  %v1183_v61 = vld [vmem:[%s4610_s3 + $0x5a8] sm:$0xff]  ;;  %v1185_v14 = vld [vmem:[%s4610_s3 + $0x5b8] sm:$0xff] }
 0x159   :  { %1534 = vmatmul.mubr.f32.gmra.mrb[16].mxu1 %v926_v32  ;;  %1306 = vmatprep.mubr.f32.mxu0 %v907_v39  ;;  %v651_v53 = vpop.f32.mrb[3].mxu0  ;;  %v1175_v39 = vld [vmem:[%s4610_s3 + $0x568] sm:$0xff]  ;;  %v957_v13 = vmul.f32 %v3539_v60, %v789_v3  ;;  %v1190_v3 = vld [vmem:[%s4610_s3 + $0x5e0] sm:$0xff] }
 0x15a   :  { %1539 = vmatprep.mubr.f32.mxu1 %v933_v40  ;;  %2384 = vmatpush1.bf16.msra.mxu1 %v2383_v31  ;;  %v652_v18 = vadd.f32 %v651_v53, %v142_v58  ;;  %v757_v31 = vld [vmem:[%s4612_s4 + $0x218] sm:$0xff]  ;;  %v2395_v40 = vpack.c.bf16 %v1172_v28, %v1170_v42  ;;  %v2397_v57 = vpack.c.bf16 %v1177_v26, %v1175_v39  ;;  %v1176_v58 = vld [vmem:[%s4610_s3 + $0x570] sm:$0xff]  ;;  %v1179_v53 = vld [vmem:[%s4610_s3 + $0x588] sm:$0xff] }
 0x15b   :  { %2386 = vmatprep.subr.bf16.mxu1 %v2385_v7  ;;  %2320 = vmatpush1.bf16.msra.mxu0 %v3094_v51  ;;  %v783_v51 = vld [vmem:[%s4612_s4 + $0x2e8] sm:$0xff]  ;;  %v650_v7 = vadd.f32 %v649_v49, %v138_v19  ;;  %v1174_v49 = vld [vmem:[%s4610_s3 + $0x560] sm:$0xff]  ;;  %v800_v39 = vld [vmem:[%s4612_s4 + $0x370] sm:$0xff] }
 0x15c   :  { %1307 = vmatmul.mubr.f32.gmra.mrb[20].mxu0 %v906_v1  ;;  %v1978_v32 = vmul.f32 -1.442695, %v652_v18  ;;  %2322 = vmatprep.subr.bf16.mxu0 %v3252_v15  ;;  %v925_v15 = vmul.f32 %v3527_v54, %v757_v31  ;;  %v951_v34 = vmul.f32 %v3539_v60, %v783_v51  ;;  %v1181_v1 = vld [vmem:[%s4610_s3 + $0x598] sm:$0xff]  ;;  %v794_v19 = vld [vmem:[%s4612_s4 + $0x340] sm:$0xff]  ;;  %v775_v42 = vld [vmem:[%s4612_s4 + $0x2a8] sm:$0xff] }
 0x15d   :  { %1540 = vmatmul.mubr.f32.gmra.mrb[18].mxu1 %v932_v36  ;;  %1312 = vmatprep.mubr.f32.mxu0 %v913_v16  ;;  %v788_v36 = vld [vmem:[%s4612_s4 + $0x310] sm:$0xff]  ;;  %v2399_v16 = vpack.c.bf16 %v1176_v58, %v1174_v49  ;;  %v2401_v9 = vpack.c.bf16 %v1181_v1, %v1179_v53  ;;  %v769_v18 = vld [vmem:[%s4612_s4 + $0x278] sm:$0xff]  ;;  %v1187_v28 = vld [vmem:[%s4610_s3 + $0x5c8] sm:$0xff]  ;;  %v962_v51 = vmul.f32 %v3524_v50, %v794_v19 }
 0x15e   :  { %1545 = vmatprep.mubr.f32.mxu1 %v939_v12  ;;  %2388 = vmatpush1.bf16.msra.mxu1 %v2387_v4  ;;  %2561 = vpow2.f32 %v1978_v32  ;;  %v924_v4 = vmul.f32 %v3512_v35, %v756_v8  ;;  %v1180_v12 = vld [vmem:[%s4610_s3 + $0x590] sm:$0xff]  ;;  %v956_v23 = vmul.f32 %v3524_v50, %v788_v36  ;;  %v1191_v8 = vld [vmem:[%s4610_s3 + $0x5e8] sm:$0xff]  ;;  %v968_v53 = vmul.f32 %v3524_v50, %v800_v39 }
 0x15f   :  { %2390 = vmatprep.subr.bf16.mxu1 %v2389_v37  ;;  %2324 = vmatpush1.bf16.msra.mxu0 %v3266_v22  ;;  %v1977_v22 = vmul.f32 -1.442695, %v650_v7  ;;  %v762_v37 = vld [vmem:[%s4612_s4 + $0x240] sm:$0xff]  ;;  %v792_v19 = vld [vmem:[%s4612_s4 + $0x330] sm:$0xff]  ;;  %v695_v39 = vld [vmem:[%s4612_s4 + $0x28] sm:$0xff] }
 0x160   :  { %1313 = vmatmul.mubr.f32.gmra.mrb[22].mxu0 %v912_v21  ;;  %2326 = vmatprep.subr.bf16.mxu0 %v3282_v30  ;;  %v931_v30 = vmul.f32 %v3527_v54, %v763_v59  ;;  %v930_v44 = vmul.f32 %v3512_v35, %v762_v37  ;;  %v2403_v21 = vpack.c.bf16 %v1180_v12, %v1178_v10  ;;  %v774_v7 = vld [vmem:[%s4612_s4 + $0x2a0] sm:$0xff] }
 0x161   :  { %1546 = vmatmul.mubr.f32.gmra.mrb[20].mxu1 %v938_v24  ;;  %1318 = vmatprep.mubr.f32.mxu0 %v919_v46  ;;  %2563 = vpow2.f32 %v1977_v22  ;;  %v2405_v24 = vpack.c.bf16 %v1185_v14, %v1183_v61  ;;  %v1182_v46 = vld [vmem:[%s4610_s3 + $0x5a0] sm:$0xff]  ;;  %v942_v58 = vmul.f32 %v3512_v35, %v774_v7  ;;  %v793_v61 = vld [vmem:[%s4612_s4 + $0x338] sm:$0xff]  ;;  %v819_v14 = vld [vmem:[%s4612_s4 + $0x408] sm:$0xff] }
 0x162   :  { %1551 = vmatprep.mubr.f32.mxu1 %v945_v29  ;;  %2392 = vmatpush1.bf16.msra.mxu1 %v2391_v63  ;;  %v768_v63 = vld [vmem:[%s4612_s4 + $0x270] sm:$0xff]  ;;  %v1189_v29 = vld [vmem:[%s4610_s3 + $0x5d8] sm:$0xff]  ;;  %v2407_v26 = vpack.c.bf16 %v1184_v27, %v1182_v46  ;;  %v798_v27 = vld [vmem:[%s4612_s4 + $0x360] sm:$0xff] }
 0x163   :  { %2394 = vmatprep.subr.bf16.mxu1 %v2393_v25  ;;  %2328 = vmatpush1.bf16.msra.mxu0 %v3296_v45  ;;  %v795_v45 = vld [vmem:[%s4612_s4 + $0x348] sm:$0xff]  ;;  %v936_v32 = vmul.f32 %v3512_v35, %v768_v63 }
 0x164   :  { %1319 = vmatmul.mubr.f32.gmra.mrb[24].mxu0 %v918_v43  ;;  %2330 = vmatprep.subr.bf16.mxu0 %v3312_v47  ;;  %v937_v47 = vmul.f32 %v3527_v54, %v769_v18  ;;  %v963_v25 = vmul.f32 %v3539_v60, %v795_v45  ;;  %v2409_v43 = vpack.c.bf16 %v1189_v29, %v1187_v28  ;;  %v812_v18 = vld [vmem:[%s4612_s4 + $0x3d0] sm:$0xff]  ;;  %v831_v28 = vld [vmem:[%s4612_s4 + $0x468] sm:$0xff] }
 0x165   :  { %1552 = vmatmul.mubr.f32.gmra.mrb[22].mxu1 %v944_v52  ;;  %1324 = vmatprep.mubr.f32.mxu0 %v925_v15  ;;  %v781_v15 = vld [vmem:[%s4612_s4 + $0x2d8] sm:$0xff]  ;;  %v980_v45 = vmul.f32 %v3524_v50, %v812_v18  ;;  %v811_v7 = vld [vmem:[%s4612_s4 + $0x3c8] sm:$0xff]  ;;  %v712_v18 = vld [vmem:[%s4612_s4 + $0xb0] sm:$0xff] }
 0x166   :  { %1557 = vmatprep.mubr.f32.mxu1 %v951_v34  ;;  %2396 = vmatpush1.bf16.msra.mxu1 %v2395_v40  ;;  %v1188_v40 = vld [vmem:[%s4610_s3 + $0x5d0] sm:$0xff]  ;;  %v949_v1 = vmul.f32 %v3527_v54, %v781_v15  ;;  %v979_v15 = vmul.f32 %v3527_v54, %v811_v7  ;;  %v710_v7 = vld [vmem:[%s4612_s4 + $0xa0] sm:$0xff] }
 0x167   :  { %2398 = vmatprep.subr.bf16.mxu1 %v2397_v57  ;;  %2332 = vmatpush1.bf16.msra.mxu0 %v3326_v55  ;;  %v801_v55 = vld [vmem:[%s4612_s4 + $0x378] sm:$0xff]  ;;  %v2411_v34 = vpack.c.bf16 %v1188_v40, %v1186_v48 }
 0x168   :  { %1325 = vmatmul.mubr.f32.gmra.mrb[26].mxu0 %v924_v4  ;;  %2334 = vmatprep.subr.bf16.mxu0 %v3342_v0  ;;  %v2562_v31 = vpop.eup %2561  ;;  %v943_v0 = vmul.f32 %v3527_v54, %v775_v42  ;;  %v969_v52 = vmul.f32 %v3539_v60, %v801_v55  ;;  %v1193_v57 = vld [vmem:[%s4610_s3 + $0x5f8] sm:$0xff]  ;;  %v1192_v4 = vld [vmem:[%s4610_s3 + $0x5f0] sm:$0xff] }
 0x169   :  { %1558 = vmatmul.mubr.f32.gmra.mrb[24].mxu1 %v950_v5  ;;  %1330 = vmatprep.mubr.f32.mxu0 %v931_v30  ;;  %v677_v49 = vadd.f32 1.0, %v2562_v31  ;;  %v2413_v22 = vpack.c.bf16 %v1193_v57, %v1191_v8  ;;  %v787_v5 = vld [vmem:[%s4612_s4 + $0x308] sm:$0xff]  ;;  %v805_v42 = vld [vmem:[%s4612_s4 + $0x398] sm:$0xff]  ;;  %v810_v8 = vld [vmem:[%s4612_s4 + $0x3c0] sm:$0xff] }
 0x16a   :  { %1563 = vmatprep.mubr.f32.mxu1 %v957_v13  ;;  %2400 = vmatpush1.bf16.msra.mxu1 %v2399_v16  ;;  %v806_v16 = vld [vmem:[%s4612_s4 + $0x3a0] sm:$0xff]  ;;  %v955_v12 = vmul.f32 %v3527_v54, %v787_v5  ;;  %v973_v31 = vmul.f32 %v3527_v54, %v805_v42 }
 0x16b   :  { %2402 = vmatprep.subr.bf16.mxu1 %v2401_v9  ;;  %2336 = vmatpush1.bf16.msra.mxu0 %v3356_v6  ;;  %v807_v6 = vld [vmem:[%s4612_s4 + $0x3a8] sm:$0xff]  ;;  %v2564_v59 = vpop.eup %2563  ;;  %2565 = vrcp.f32 %v677_v49  ;;  %v2415_v9 = vpack.c.bf16 %v1192_v4, %v1190_v3  ;;  %v974_v10 = vmul.f32 %v3524_v50, %v806_v16  ;;  %v694_v57 = vld [vmem:[%s4612_s4 + $0x20] sm:$0xff]  ;;  %v817_v49 = vld [vmem:[%s4612_s4 + $0x3f8] sm:$0xff] }
 0x16c   :  { %1331 = vmatmul.mubr.f32.gmra.mrb[28].mxu0 %v930_v44  ;;  %2338 = vmatprep.subr.bf16.mxu0 %v3372_v17  ;;  %v780_v17 = vld [vmem:[%s4612_s4 + $0x2d0] sm:$0xff]  ;;  %v975_v36 = vmul.f32 %v3539_v60, %v807_v6  ;;  %v676_v30 = vadd.f32 1.0, %v2564_v59  ;;  %v961_v44 = vmul.f32 %v3527_v54, %v793_v61  ;;  %v978_v6 = vmul.f32 %v3512_v35, %v810_v8  ;;  %v822_v16 = vld [vmem:[%s4612_s4 + $0x420] sm:$0xff]  ;;  %v693_v61 = vld [vmem:[%s4612_s4 + $0x18] sm:$0xff] }
 0x16d   :  { %1564 = vmatmul.mubr.f32.gmra.mrb[26].mxu1 %v956_v23  ;;  %1336 = vmatprep.mubr.f32.mxu0 %v937_v47  ;;  %v948_v37 = vmul.f32 %v3512_v35, %v780_v17  ;;  %v799_v23 = vld [vmem:[%s4612_s4 + $0x368] sm:$0xff]  ;;  %v825_v47 = vld [vmem:[%s4612_s4 + $0x438] sm:$0xff]  ;;  %v816_v59 = vld [vmem:[%s4612_s4 + $0x3f0] sm:$0xff] }
 0x16e   :  { %1569 = vmatprep.mubr.f32.mxu1 %v963_v25  ;;  %2404 = vmatpush1.bf16.msra.mxu1 %v2403_v21  ;;  %2567 = vrcp.f32 %v676_v30  ;;  %v818_v21 = vld [vmem:[%s4612_s4 + $0x400] sm:$0xff]  ;;  %v967_v46 = vmul.f32 %v3527_v54, %v799_v23  ;;  %v824_v25 = vld [vmem:[%s4612_s4 + $0x430] sm:$0xff]  ;;  %v823_v17 = vld [vmem:[%s4612_s4 + $0x428] sm:$0xff]  ;;  %v984_v3 = vmul.f32 %v3512_v35, %v816_v59 }
 0x16f   :  { %2406 = vmatprep.subr.bf16.mxu1 %v2405_v24  ;;  %2340 = vmatpush1.bf16.msra.mxu0 %v3386_v2  ;;  %v813_v2 = vld [vmem:[%s4612_s4 + $0x3d8] sm:$0xff]  ;;  %v986_v24 = vmul.f32 %v3524_v50, %v818_v21  ;;  %v992_v55 = vmul.f32 %v3524_v50, %v824_v25  ;;  %v699_v21 = vld [vmem:[%s4612_s4 + $0x48] sm:$0xff] }
 0x170   :  { %1337 = vmatmul.mubr.f32.gmra.mrb[30].mxu0 %v936_v32  ;;  %2342 = vmatprep.subr.bf16.mxu0 %v3402_v33  ;;  %v786_v33 = vld [vmem:[%s4612_s4 + $0x300] sm:$0xff]  ;;  %v981_v13 = vmul.f32 %v3539_v60, %v813_v2  ;;  %v804_v32 = vld [vmem:[%s4612_s4 + $0x390] sm:$0xff]  ;;  %v829_v30 = vld [vmem:[%s4612_s4 + $0x458] sm:$0xff] }
 0x171   :  { %1570 = vmatmul.mubr.f32.gmra.mrb[28].mxu1 %v962_v51  ;;  %1342 = vmatprep.mubr.f32.mxu0 %v943_v0  ;;  %v999_v51 = vmul.f32 %v3539_v60, %v831_v28  ;;  %v830_v0 = vld [vmem:[%s4612_s4 + $0x460] sm:$0xff] }
 0x172   :  { %1575 = vmatprep.mubr.f32.mxu1 %v969_v52  ;;  %2408 = vmatpush1.bf16.msra.mxu1 %v2407_v26  ;;  %v998_v52 = vmul.f32 %v3524_v50, %v830_v0  ;;  %v706_v2 = vld [vmem:[%s4612_s4 + $0x80] sm:$0xff] }
 0x173   :  { %2410 = vmatprep.subr.bf16.mxu1 %v2409_v43  ;;  %2344 = vmatpush1.bf16.msra.mxu0 %v3416_v41  ;;  %v954_v41 = vmul.f32 %v3512_v35, %v786_v33  ;;  %v972_v43 = vmul.f32 %v3512_v35, %v804_v32  ;;  %v828_v33 = vld [vmem:[%s4612_s4 + $0x450] sm:$0xff]  ;;  %v711_v32 = vld [vmem:[%s4612_s4 + $0xa8] sm:$0xff] }
 0x174   :  { %1343 = vmatmul.mubr.f32.gmra.mrb[32].mxu0 %v942_v58  ;;  %2346 = vmatprep.subr.bf16.mxu0 %v3432_v56  ;;  %v987_v56 = vmul.f32 %v3539_v60, %v819_v14  ;;  %v996_v14 = vmul.f32 %v3512_v35, %v828_v33  ;;  %v879_v0 = vmul.f32 %v3539_v60, %v711_v32 }
 0x175   :  { %1576 = vmatmul.mubr.f32.gmra.mrb[30].mxu1 %v968_v53  ;;  %1348 = vmatprep.mubr.f32.mxu0 %v949_v1  ;;  %v2566_v63 = vpop.eup %2565  ;;  %v700_v1 = vld [vmem:[%s4612_s4 + $0x50] sm:$0xff] }
 0x176   :  { %1581 = vmatprep.mubr.f32.mxu1 %v975_v36  ;;  %2412 = vmatpush1.bf16.msra.mxu1 %v2411_v34  ;;  %v4053_v29 = vrot.slane %v2566_v63, %v3496_v38  ;;  %v985_v34 = vmul.f32 %v3527_v54, %v817_v49  ;;  %v991_v36 = vmul.f32 %v3527_v54, %v823_v17  ;;  %v698_v63 = vld [vmem:[%s4612_s4 + $0x40] sm:$0xff]  ;;  %v749_v49 = vld [vmem:[%s4612_s4 + $0x1d8] sm:$0xff] }
 0x177   :  { %2414 = vmatprep.subr.bf16.mxu1 %v2413_v22  ;;  %2348 = vmatpush1.bf16.msra.mxu0 %v3446_v62  ;;  %v960_v62 = vmul.f32 %v3512_v35, %v792_v19  ;;  %v707_v22 = vld [vmem:[%s4612_s4 + $0x88] sm:$0xff]  ;;  %v866_v25 = vmul.f32 %v3524_v50, %v698_v63 }
 0x178   :  { %1349 = vmatmul.mubr.f32.gmra.mrb[34].mxu0 %v948_v37  ;;  %2350 = vmatprep.subr.bf16.mxu0 %v3462_v11  ;;  %v993_v11 = vmul.f32 %v3539_v60, %v825_v47  ;;  %v2568_v26 = vpop.eup %2567  ;;  %v863_v48 = vmul.f32 %v4053_v29, %v695_v39  ;;  %v875_v5 = vmul.f32 %v4053_v29, %v707_v22  ;;  %v713_v37 = vld [vmem:[%s4612_s4 + $0xb8] sm:$0xff] }
 0x179   :  { %1582 = vmatmul.mubr.f32.gmra.mrb[32].mxu1 %v974_v10  ;;  %1354 = vmatprep.mubr.f32.mxu0 %v955_v12  ;;  %v4074_v40 = vrot.slane %v2568_v26, %v3496_v38  ;;  %v701_v38 = vld [vmem:[%s4612_s4 + $0x58] sm:$0xff]  ;;  %v997_v12 = vmul.f32 %v3527_v54, %v829_v30  ;;  %v719_v54 = vld [vmem:[%s4612_s4 + $0xe8] sm:$0xff] }
 0x17a   :  { %1587 = vmatprep.mubr.f32.mxu1 %v981_v13  ;;  %2416 = vmatpush1.bf16.msra.mxu1 %v2415_v9  ;;  %v869_v53 = vmul.f32 %v4053_v29, %v701_v38  ;;  %v990_v9 = vmul.f32 %v3512_v35, %v822_v16  ;;  %v881_v13 = vmul.f32 %v4053_v29, %v713_v37  ;;  %v737_v39 = vld [vmem:[%s4612_s4 + $0x178] sm:$0xff] }
 0x17b   :  { %2352 = vmatpush1.bf16.msra.mxu0 %v3476_v20  ;;  %v966_v20 = vmul.f32 %v3512_v35, %v798_v27  ;;  %v862_v58 = vmul.f32 %v4074_v40, %v694_v57  ;;  %v868_v4 = vmul.f32 %v4074_v40, %v700_v1  ;;  %v874_v10 = vmul.f32 %v4074_v40, %v706_v2  ;;  %v725_v35 = vld [vmem:[%s4612_s4 + $0x118] sm:$0xff]  ;;  %v742_v57 = vld [vmem:[%s4612_s4 + $0x1a0] sm:$0xff] }
 0x17c   :  { %1355 = vmatmul.mubr.f32.gmra.mrb[36].mxu0 %v954_v41  ;;  %v880_v41 = vmul.f32 %v4074_v40, %v712_v18  ;;  %v887_v19 = vmul.f32 %v4053_v29, %v719_v54  ;;  %v705_v27 = vld [vmem:[%s4612_s4 + $0x78] sm:$0xff]  ;;  %v910_v38 = vmul.f32 %v4074_v40, %v742_v57 }
 0x17d   :  { %1588 = vmatmul.mubr.f32.gmra.mrb[34].mxu1 %v980_v45  ;;  %1360 = vmatprep.mubr.f32.mxu0 %v961_v44  ;;  %v861_v45 = vmul.f32 %v3539_v60, %v693_v61  ;;  %v692_v44 = vld [vmem:[%s4612_s4 + $0x10] sm:$0xff]  ;;  %v873_v28 = vmul.f32 %v3539_v60, %v705_v27  ;;  %v761_v1 = vld [vmem:[%s4612_s4 + $0x238] sm:$0xff] }
 0x17e   :  { %1593 = vmatprep.mubr.f32.mxu1 %v987_v56  ;;  %v718_v56 = vld [vmem:[%s4612_s4 + $0xe0] sm:$0xff]  ;;  %v860_v23 = vmul.f32 %v3524_v50, %v692_v44  ;;  %v929_v22 = vmul.f32 %v4053_v29, %v761_v1  ;;  %v773_v2 = vld [vmem:[%s4612_s4 + $0x298] sm:$0xff] }
 0x17f   :  { %v886_v47 = vmul.f32 %v4074_v40, %v718_v56  ;;  %v941_v37 = vmul.f32 %v4053_v29, %v773_v2  ;;  %v785_v18 = vld [vmem:[%s4612_s4 + $0x2f8] sm:$0xff] }
 0x180   :  { %1361 = vmatmul.mubr.f32.gmra.mrb[38].mxu0 %v960_v62  ;;  %v867_v62 = vmul.f32 %v3539_v60, %v699_v21  ;;  %v878_v60 = vmul.f32 %v3524_v50, %v710_v7  ;;  %v953_v54 = vmul.f32 %v4053_v29, %v785_v18  ;;  %v797_v56 = vld [vmem:[%s4612_s4 + $0x358] sm:$0xff] }
 0x181   :  { %1594 = vmatmul.mubr.f32.gmra.mrb[36].mxu1 %v986_v24  ;;  %1366 = vmatprep.mubr.f32.mxu0 %v967_v46  ;;  %v893_v24 = vmul.f32 %v4053_v29, %v725_v35  ;;  %v724_v46 = vld [vmem:[%s4612_s4 + $0x110] sm:$0xff]  ;;  %v965_v35 = vmul.f32 %v4053_v29, %v797_v56 }
 0x182   :  { %1599 = vmatprep.mubr.f32.mxu1 %v993_v11  ;;  %v731_v11 = vld [vmem:[%s4612_s4 + $0x148] sm:$0xff]  ;;  %v892_v42 = vmul.f32 %v4074_v40, %v724_v46  ;;  %v809_v46 = vld [vmem:[%s4612_s4 + $0x3b8] sm:$0xff] }
 0x184   :  { %1367 = vmatmul.mubr.f32.gmra.mrb[40].mxu0 %v966_v20  ;;  %v704_v20 = vld [vmem:[%s4612_s4 + $0x70] sm:$0xff] }
 0x185   :  { %1600 = vmatmul.mubr.f32.gmra.mrb[38].mxu1 %v992_v55  ;;  %1372 = vmatprep.mubr.f32.mxu0 %v973_v31  ;;  %v899_v55 = vmul.f32 %v4053_v29, %v731_v11  ;;  %v730_v31 = vld [vmem:[%s4612_s4 + $0x140] sm:$0xff]  ;;  %v872_v26 = vmul.f32 %v3524_v50, %v704_v20  ;;  %v748_v50 = vld [vmem:[%s4612_s4 + $0x1d0] sm:$0xff]  ;;  %v977_v11 = vmul.f32 %v4053_v29, %v809_v46 }
 0x186   :  { %1605 = vmatprep.mubr.f32.mxu1 %v999_v51  ;;  %v898_v51 = vmul.f32 %v4074_v40, %v730_v31  ;;  %v821_v31 = vld [vmem:[%s4612_s4 + $0x418] sm:$0xff] }
 0x188   :  { %1373 = vmatmul.mubr.f32.gmra.mrb[42].mxu0 %v972_v43  ;;  %v905_v43 = vmul.f32 %v4053_v29, %v737_v39  ;;  %v989_v39 = vmul.f32 %v4053_v29, %v821_v31 }
 0x189   :  { %1606 = vmatmul.mubr.f32.gmra.mrb[40].mxu1 %v998_v52  ;;  %1378 = vmatprep.mubr.f32.mxu0 %v979_v15  ;;  %v743_v52 = vld [vmem:[%s4612_s4 + $0x1a8] sm:$0xff] }
 0x18a   :  { %1676 = vmatprep.mubr.f32.mxu1 %v863_v48  ;;  %v736_v48 = vld [vmem:[%s4612_s4 + $0x170] sm:$0xff]  ;;  %v911_v8 = vmul.f32 %v4053_v29, %v743_v52 }
 0x18b   :  { %v904_v15 = vmul.f32 %v4074_v40, %v736_v48  ;;  %v833_v48 = vld [vmem:[%s4612_s4 + $0x478] sm:$0xff] }
 0x18c   :  { %1379 = vmatmul.mubr.f32.gmra.mrb[44].mxu0 %v978_v6  ;;  %v917_v6 = vmul.f32 %v4053_v29, %v749_v49 }
 0x18d   :  { %1677 = vmatmul.mubr.f32.vlgmr.msra.gmra.mrb[42].mxu1 %v862_v58  ;;  %1384 = vmatprep.mubr.f32.mxu0 %v985_v34  ;;  %v755_v58 = vld [vmem:[%s4612_s4 + $0x208] sm:$0xff]  ;;  %v916_v34 = vmul.f32 %v4074_v40, %v748_v50 }
 0x18e   :  { %1682 = vmatprep.mubr.f32.mxu1 %v869_v53  ;;  %v923_v59 = vmul.f32 %v4053_v29, %v755_v58  ;;  %v754_v53 = vld [vmem:[%s4612_s4 + $0x200] sm:$0xff] }
 0x18f   :  { %v922_v17 = vmul.f32 %v4074_v40, %v754_v53 }
 0x190   :  { %1385 = vmatmul.mubr.f32.gmra.mrb[46].mxu0 %v984_v3  ;;  %v760_v3 = vld [vmem:[%s4612_s4 + $0x230] sm:$0xff] }
 0x191   :  { %1683 = vmatmul.mubr.f32.gmra.mrb[44].mxu1 %v868_v4  ;;  %1390 = vmatprep.mubr.f32.mxu0 %v991_v36  ;;  %v767_v4 = vld [vmem:[%s4612_s4 + $0x268] sm:$0xff]  ;;  %v928_v36 = vmul.f32 %v4074_v40, %v760_v3 }
 0x192   :  { %1688 = vmatprep.mubr.f32.mxu1 %v875_v5  ;;  %v935_v16 = vmul.f32 %v4053_v29, %v767_v4  ;;  %v766_v5 = vld [vmem:[%s4612_s4 + $0x260] sm:$0xff] }
 0x193   :  { %v934_v30 = vmul.f32 %v4074_v40, %v766_v5 }
 0x194   :  { %1391 = vmatmul.mubr.f32.gmra.mrb[48].mxu0 %v990_v9  ;;  %v772_v9 = vld [vmem:[%s4612_s4 + $0x290] sm:$0xff] }
 0x195   :  { %1689 = vmatmul.mubr.f32.gmra.mrb[46].mxu1 %v874_v10  ;;  %1396 = vmatprep.mubr.f32.mxu0 %v997_v12  ;;  %v779_v10 = vld [vmem:[%s4612_s4 + $0x2c8] sm:$0xff]  ;;  %v940_v12 = vmul.f32 %v4074_v40, %v772_v9 }
 0x196   :  { %1694 = vmatprep.mubr.f32.mxu1 %v881_v13  ;;  %v947_v33 = vmul.f32 %v4053_v29, %v779_v10  ;;  %v778_v13 = vld [vmem:[%s4612_s4 + $0x2c0] sm:$0xff] }
 0x197   :  { %v946_v61 = vmul.f32 %v4074_v40, %v778_v13 }
 0x198   :  { %1397 = vmatmul.mubr.f32.gmra.mrb[50].mxu0 %v996_v14  ;;  %v784_v14 = vld [vmem:[%s4612_s4 + $0x2f0] sm:$0xff] }
 0x199   :  { %1695 = vmatmul.mubr.f32.gmra.mrb[48].mxu1 %v880_v41  ;;  %1467 = vmatprep.mubr.f32.mxu0 %v861_v45  ;;  %v791_v41 = vld [vmem:[%s4612_s4 + $0x328] sm:$0xff]  ;;  %v952_v45 = vmul.f32 %v4074_v40, %v784_v14 }
 0x19a   :  { %1700 = vmatprep.mubr.f32.mxu1 %v887_v19  ;;  %v959_v44 = vmul.f32 %v4053_v29, %v791_v41  ;;  %v790_v19 = vld [vmem:[%s4612_s4 + $0x320] sm:$0xff] }
 0x19b   :  { %v958_v21 = vmul.f32 %v4074_v40, %v790_v19 }
 0x19c   :  { %1468 = vmatmul.mubr.f32.vlgmr.msra.gmra.mrb[4].mxu0 %v860_v23  ;;  %v796_v23 = vld [vmem:[%s4612_s4 + $0x350] sm:$0xff] }
 0x19d   :  { %1701 = vmatmul.mubr.f32.gmra.mrb[2].mxu1 %v886_v47  ;;  %1473 = vmatprep.mubr.f32.mxu0 %v867_v62  ;;  %v803_v47 = vld [vmem:[%s4612_s4 + $0x388] sm:$0xff]  ;;  %v964_v62 = vmul.f32 %v4074_v40, %v796_v23 }
 0x19e   :  { %1706 = vmatprep.mubr.f32.mxu1 %v893_v24  ;;  %v971_v63 = vmul.f32 %v4053_v29, %v803_v47  ;;  %v802_v24 = vld [vmem:[%s4612_s4 + $0x380] sm:$0xff] }
 0x19f   :  { %v970_v27 = vmul.f32 %v4074_v40, %v802_v24 }
 0x1a0   :  { %1474 = vmatmul.mubr.f32.gmra.mrb[6].mxu0 %v866_v25  ;;  %v808_v25 = vld [vmem:[%s4612_s4 + $0x3b0] sm:$0xff] }
 0x1a1   :  { %1707 = vmatmul.mubr.f32.gmra.mrb[4].mxu1 %v892_v42  ;;  %1479 = vmatprep.mubr.f32.mxu0 %v873_v28  ;;  %v815_v42 = vld [vmem:[%s4612_s4 + $0x3e8] sm:$0xff]  ;;  %v976_v28 = vmul.f32 %v4074_v40, %v808_v25 }
 0x1a2   :  { %1712 = vmatprep.mubr.f32.mxu1 %v899_v55  ;;  %v983_v20 = vmul.f32 %v4053_v29, %v815_v42  ;;  %v814_v55 = vld [vmem:[%s4612_s4 + $0x3e0] sm:$0xff] }
 0x1a3   :  { %v982_v32 = vmul.f32 %v4074_v40, %v814_v55 }
 0x1a4   :  { %1480 = vmatmul.mubr.f32.gmra.mrb[8].mxu0 %v872_v26  ;;  %v820_v26 = vld [vmem:[%s4612_s4 + $0x410] sm:$0xff] }
 0x1a5   :  { %1713 = vmatmul.mubr.f32.gmra.mrb[6].mxu1 %v898_v51  ;;  %1485 = vmatprep.mubr.f32.mxu0 %v879_v0  ;;  %v827_v51 = vld [vmem:[%s4612_s4 + $0x448] sm:$0xff]  ;;  %v988_v0 = vmul.f32 %v4074_v40, %v820_v26 }
 0x1a6   :  { %1718 = vmatprep.mubr.f32.mxu1 %v905_v43  ;;  %v995_v7 = vmul.f32 %v4053_v29, %v827_v51  ;;  %v826_v43 = vld [vmem:[%s4612_s4 + $0x440] sm:$0xff] }
 0x1a7   :  { %v994_v52 = vmul.f32 %v4074_v40, %v826_v43 }
 0x1a8   :  { %1486 = vmatmul.mubr.f32.gmra.mrb[10].mxu0 %v878_v60  ;;  %v1001_v60 = vmul.f32 %v4053_v29, %v833_v48 }
 0x1a9   :  { %1719 = vmatmul.mubr.f32.gmra.mrb[8].mxu1 %v904_v15  ;;  %v832_v15 = vld [vmem:[%s4612_s4 + $0x470] sm:$0xff] }
 0x1aa   :  { %1724 = vmatprep.mubr.f32.mxu1 %v911_v8  ;;  %v1000_v8 = vmul.f32 %v4074_v40, %v832_v15 }
 0x1ad   :  { %1725 = vmatmul.mubr.f32.gmra.mrb[10].mxu1 %v910_v38 }
 0x1ae   :  { %1730 = vmatprep.mubr.f32.mxu1 %v917_v6 }
 0x1b1   :  { %1731 = vmatmul.mubr.f32.gmra.mrb[12].mxu1 %v916_v34 }
 0x1b2   :  { %1736 = vmatprep.mubr.f32.mxu1 %v923_v59 }
 0x1b5   :  { %1737 = vmatmul.mubr.f32.gmra.mrb[14].mxu1 %v922_v17 }
 0x1b6   :  { %1742 = vmatprep.mubr.f32.mxu1 %v929_v22 }
 0x1b9   :  { %1743 = vmatmul.mubr.f32.gmra.mrb[16].mxu1 %v928_v36 }
 0x1ba   :  { %1748 = vmatprep.mubr.f32.mxu1 %v935_v16 }
 0x1bd   :  { %1749 = vmatmul.mubr.f32.gmra.mrb[18].mxu1 %v934_v30 }
 0x1be   :  { %1754 = vmatprep.mubr.f32.mxu1 %v941_v37 }
 0x1c1   :  { %1755 = vmatmul.mubr.f32.gmra.mrb[20].mxu1 %v940_v12 }
 0x1c2   :  { %1760 = vmatprep.mubr.f32.mxu1 %v947_v33 }
 0x1c5   :  { %1761 = vmatmul.mubr.f32.gmra.mrb[22].mxu1 %v946_v61 }
 0x1c6   :  { %1766 = vmatprep.mubr.f32.mxu1 %v953_v54 }
 0x1c9   :  { %1767 = vmatmul.mubr.f32.gmra.mrb[24].mxu1 %v952_v45 }
 0x1ca   :  { %1772 = vmatprep.mubr.f32.mxu1 %v959_v44 }
 0x1cd   :  { %1773 = vmatmul.mubr.f32.gmra.mrb[26].mxu1 %v958_v21 }
 0x1ce   :  { %1778 = vmatprep.mubr.f32.mxu1 %v965_v35 }
 0x1d1   :  { %1779 = vmatmul.mubr.f32.gmra.mrb[28].mxu1 %v964_v62 }
 0x1d2   :  { %1784 = vmatprep.mubr.f32.mxu1 %v971_v63 }
 0x1d5   :  { %1785 = vmatmul.mubr.f32.gmra.mrb[30].mxu1 %v970_v27 }
 0x1d6   :  { %1790 = vmatprep.mubr.f32.mxu1 %v977_v11 }
 0x1d9   :  { %1791 = vmatmul.mubr.f32.gmra.mrb[32].mxu1 %v976_v28 }
 0x1da   :  { %1796 = vmatprep.mubr.f32.mxu1 %v983_v20 }
 0x1dd   :  { %1797 = vmatmul.mubr.f32.gmra.mrb[34].mxu1 %v982_v32 }
 0x1de   :  { %1802 = vmatprep.mubr.f32.mxu1 %v989_v39 }
 0x1e1   :  { %1803 = vmatmul.mubr.f32.gmra.mrb[36].mxu1 %v988_v0 }
 0x1e2   :  { %1808 = vmatprep.mubr.f32.mxu1 %v995_v7 }
 0x1e5   :  { %1809 = vmatmul.mubr.f32.gmra.mrb[38].mxu1 %v994_v52 }
 0x1e6   :  { %1814 = vmatprep.mubr.f32.mxu1 %v1001_v60 }
 0x1e9   :  { %1815 = vmatmul.mubr.f32.gmra.mrb[40].mxu1 %v1000_v8 }
 0x21f   :  { %v1284_v57 = vpop.f32.mrb[12].mxu0 }
 0x220   :  { %v1286_v49 = vpop.f32.mrb[13].mxu0 }
 0x223   :  { %v4326_v38 = vpop.f32.mrb[14].mxu0 }
 0x224   :  { %v4328_v6 = vpop.f32.mrb[15].mxu0 }
 0x227   :  { %v4330_v50 = vpop.f32.mrb[16].mxu0 }
 0x228   :  { %v4332_v58 = vpop.f32.mrb[17].mxu0 }
 0x22b   :  { %v4334_v29 = vpop.f32.mrb[18].mxu0 }
 0x22c   :  { %v4336_v34 = vpop.f32.mrb[19].mxu0 }
 0x22f   :  { %v4338_v59 = vpop.f32.mrb[20].mxu0 }
 0x230   :  { %v4340_v53 = vpop.f32.mrb[21].mxu0 }
 0x233   :  { %v4342_v40 = vpop.f32.mrb[22].mxu0 }
 0x234   :  { %v4344_v1 = vpop.f32.mrb[23].mxu0 }
 0x237   :  { %v4346_v17 = vpop.f32.mrb[24].mxu0 }
 0x238   :  { %v4348_v22 = vpop.f32.mrb[25].mxu0 }
 0x23b   :  { %v4350_v3 = vpop.f32.mrb[26].mxu0 }
 0x23c   :  { %v4352_v4 = vpop.f32.mrb[27].mxu0 }
 0x23f   :  { %v4354_v36 = vpop.f32.mrb[28].mxu0 }
 0x240   :  { %v4356_v16 = vpop.f32.mrb[29].mxu0 }
 0x243   :  { %v4358_v5 = vpop.f32.mrb[30].mxu0 }
 0x244   :  { %v4360_v2 = vpop.f32.mrb[31].mxu0 }
 0x247   :  { %v4362_v30 = vpop.f32.mrb[32].mxu0 }
 0x248   :  { %v4364_v37 = vpop.f32.mrb[33].mxu0 }
 0x24b   :  { %v4366_v9 = vpop.f32.mrb[34].mxu0 }
 0x24c   :  { %v4368_v10 = vpop.f32.mrb[35].mxu0 }
 0x24f   :  { %v4370_v12 = vpop.f32.mrb[36].mxu0 }
 0x250   :  { %v4372_v33 = vpop.f32.mrb[37].mxu0 }
 0x253   :  { %v4374_v13 = vpop.f32.mrb[38].mxu0 }
 0x254   :  { %v4376_v18 = vpop.f32.mrb[39].mxu0 }
 0x257   :  { %v4378_v61 = vpop.f32.mrb[40].mxu0 }
 0x258   :  { %v4380_v54 = vpop.f32.mrb[41].mxu0 }
 0x25b   :  { %v4382_v14 = vpop.f32.mrb[42].mxu0 }
 0x25c   :  { %v4384_v41 = vpop.f32.mrb[43].mxu0 }
 0x25f   :  { %v4386_v45 = vpop.f32.mrb[44].mxu0 }
 0x260   :  { %v1678_v44 = vpop.f32.mrb[42].mxu1  ;;  %v4388_v19 = vpop.f32.mrb[45].mxu0 }
 0x261   :  { %v1680_v56 = vpop.f32.mrb[43].mxu1 }
 0x263   :  { %v4390_v21 = vpop.f32.mrb[46].mxu0 }
 0x264   :  { %v1684_v35 = vpop.f32.mrb[44].mxu1  ;;  %v4392_v23 = vpop.f32.mrb[47].mxu0 }
 0x265   :  { %v1686_v47 = vpop.f32.mrb[45].mxu1 }
 0x267   :  { %v4394_v62 = vpop.f32.mrb[48].mxu0 }
 0x268   :  { %v1690_v63 = vpop.f32.mrb[46].mxu1  ;;  %v4396_v24 = vpop.f32.mrb[49].mxu0 }
 0x269   :  { %v1692_v46 = vpop.f32.mrb[47].mxu1 }
 0x26b   :  { %v4398_v27 = vpop.f32.mrb[50].mxu0 }
 0x26c   :  { %v1696_v11 = vpop.f32.mrb[48].mxu1  ;;  %v4400_v25 = vpop.f32.mrb[51].mxu0 }
 0x26d   :  { %v1698_v42 = vpop.f32.mrb[49].mxu1 }
 0x26f   :  { %v1469_v28 = vpop.f32.mrb[4].mxu0 }
 0x270   :  { %v2449_v20 = vadd.f32 %v1678_v44, %v1469_v28  ;;  %v1702_v55 = vpop.f32.mrb[2].mxu1  ;;  %v1471_v31 = vpop.f32.mrb[5].mxu0 }
 0x271   :  { %v2457_v32 = vadd.f32 %v1702_v55, %v1284_v57  ;;  %v2450_v39 = vadd.f32 %v1680_v56, %v1471_v31  ;;  %v1704_v26 = vpop.f32.mrb[3].mxu1 }
 0x272   :  { %1821 = vst [vmem:[%s4613_s5] sm:$0xff] %v2449_v20  ;;  %v2458_v51 = vadd.f32 %v1704_v26, %v1286_v49 }
 0x273   :  { %1830 = vst [vmem:[%s4613_s5 + $0x40] sm:$0xff] %v2457_v32  ;;  %1823 = vst.msk [vmem:[%s4613_s5 + $0x8] sm:$0xff] %vm1822_vm2, %v2450_v39  ;;  %v1475_v0 = vpop.f32.mrb[6].mxu0 }
 0x274   :  { %1831 = vst.msk [vmem:[%s4613_s5 + $0x48] sm:$0xff] %vm1822_vm2, %v2458_v51  ;;  %v2451_v7 = vadd.f32 %v1684_v35, %v1475_v0  ;;  %v1708_v43 = vpop.f32.mrb[4].mxu1  ;;  %v1477_v48 = vpop.f32.mrb[7].mxu0 }
 0x275   :  { %v2459_v52 = vadd.f32 %v1708_v43, %v4326_v38  ;;  %v2452_v60 = vadd.f32 %v1686_v47, %v1477_v48  ;;  %v1710_v15 = vpop.f32.mrb[5].mxu1 }
 0x276   :  { %1824 = vst [vmem:[%s4613_s5 + $0x10] sm:$0xff] %v2451_v7  ;;  %v2460_v8 = vadd.f32 %v1710_v15, %v4328_v6 }
 0x277   :  { %1832 = vst [vmem:[%s4613_s5 + $0x50] sm:$0xff] %v2459_v52  ;;  %1825 = vst.msk [vmem:[%s4613_s5 + $0x18] sm:$0xff] %vm1822_vm2, %v2452_v60  ;;  %v1481_v57 = vpop.f32.mrb[8].mxu0 }
 0x278   :  { %1833 = vst.msk [vmem:[%s4613_s5 + $0x58] sm:$0xff] %vm1822_vm2, %v2460_v8  ;;  %v2453_v49 = vadd.f32 %v1690_v63, %v1481_v57  ;;  %v1714_v38 = vpop.f32.mrb[6].mxu1  ;;  %v1483_v44 = vpop.f32.mrb[9].mxu0 }
 0x279   :  { %v2461_v6 = vadd.f32 %v1714_v38, %v4330_v50  ;;  %v2454_v56 = vadd.f32 %v1692_v46, %v1483_v44  ;;  %v1716_v35 = vpop.f32.mrb[7].mxu1 }
 0x27a   :  { %1826 = vst [vmem:[%s4613_s5 + $0x20] sm:$0xff] %v2453_v49  ;;  %v2462_v47 = vadd.f32 %v1716_v35, %v4332_v58 }
 0x27b   :  { %1834 = vst [vmem:[%s4613_s5 + $0x60] sm:$0xff] %v2461_v6  ;;  %1827 = vst.msk [vmem:[%s4613_s5 + $0x28] sm:$0xff] %vm1822_vm2, %v2454_v56  ;;  %v1487_v63 = vpop.f32.mrb[10].mxu0 }
 0x27c   :  { %1835 = vst.msk [vmem:[%s4613_s5 + $0x68] sm:$0xff] %vm1822_vm2, %v2462_v47  ;;  %v2455_v50 = vadd.f32 %v1696_v11, %v1487_v63  ;;  %v1720_v46 = vpop.f32.mrb[8].mxu1  ;;  %v1489_v28 = vpop.f32.mrb[11].mxu0 }
 0x27d   :  { %v2463_v58 = vadd.f32 %v1720_v46, %v4334_v29  ;;  %v2456_v20 = vadd.f32 %v1698_v42, %v1489_v28  ;;  %v1722_v55 = vpop.f32.mrb[9].mxu1 }
 0x27e   :  { %1828 = vst [vmem:[%s4613_s5 + $0x30] sm:$0xff] %v2455_v50  ;;  %v2464_v31 = vadd.f32 %v1722_v55, %v4336_v34 }
 0x27f   :  { %1836 = vst [vmem:[%s4613_s5 + $0x70] sm:$0xff] %v2463_v58  ;;  %1829 = vst.msk [vmem:[%s4613_s5 + $0x38] sm:$0xff] %vm1822_vm2, %v2456_v20 }
 0x280   :  { %1837 = vst.msk [vmem:[%s4613_s5 + $0x78] sm:$0xff] %vm1822_vm2, %v2464_v31  ;;  %v1726_v29 = vpop.f32.mrb[10].mxu1 }
 0x281   :  { %v2465_v11 = vadd.f32 %v1726_v29, %v4338_v59  ;;  %v1728_v42 = vpop.f32.mrb[11].mxu1 }
 0x282   :  { %v2466_v34 = vadd.f32 %v1728_v42, %v4340_v53 }
 0x283   :  { %1838 = vst [vmem:[%s4613_s5 + $0x80] sm:$0xff] %v2465_v11 }
 0x284   :  { %1839 = vst.msk [vmem:[%s4613_s5 + $0x88] sm:$0xff] %vm1822_vm2, %v2466_v34  ;;  %v1732_v32 = vpop.f32.mrb[12].mxu1 }
 0x285   :  { %v2467_v39 = vadd.f32 %v1732_v32, %v4342_v40  ;;  %v1734_v26 = vpop.f32.mrb[13].mxu1 }
 0x286   :  { %v2468_v51 = vadd.f32 %v1734_v26, %v4344_v1 }
 0x287   :  { %1840 = vst [vmem:[%s4613_s5 + $0x90] sm:$0xff] %v2467_v39 }
 0x288   :  { %1841 = vst.msk [vmem:[%s4613_s5 + $0x98] sm:$0xff] %vm1822_vm2, %v2468_v51  ;;  %v1738_v59 = vpop.f32.mrb[14].mxu1 }
 0x289   :  { %v2469_v53 = vadd.f32 %v1738_v59, %v4346_v17  ;;  %v1740_v0 = vpop.f32.mrb[15].mxu1 }
 0x28a   :  { %v2470_v7 = vadd.f32 %v1740_v0, %v4348_v22 }
 0x28b   :  { %1842 = vst [vmem:[%s4613_s5 + $0xa0] sm:$0xff] %v2469_v53 }
 0x28c   :  { %1843 = vst.msk [vmem:[%s4613_s5 + $0xa8] sm:$0xff] %vm1822_vm2, %v2470_v7  ;;  %v1744_v40 = vpop.f32.mrb[16].mxu1 }
 0x28d   :  { %v2471_v1 = vadd.f32 %v1744_v40, %v4350_v3  ;;  %v1746_v43 = vpop.f32.mrb[17].mxu1 }
 0x28e   :  { %v2472_v48 = vadd.f32 %v1746_v43, %v4352_v4 }
 0x28f   :  { %1844 = vst [vmem:[%s4613_s5 + $0xb0] sm:$0xff] %v2471_v1 }
 0x290   :  { %1845 = vst.msk [vmem:[%s4613_s5 + $0xb8] sm:$0xff] %vm1822_vm2, %v2472_v48  ;;  %v1750_v17 = vpop.f32.mrb[18].mxu1 }
 0x291   :  { %v2473_v22 = vadd.f32 %v1750_v17, %v4354_v36  ;;  %v1752_v52 = vpop.f32.mrb[19].mxu1 }
 0x292   :  { %v2474_v60 = vadd.f32 %v1752_v52, %v4356_v16 }
 0x293   :  { %1846 = vst [vmem:[%s4613_s5 + $0xc0] sm:$0xff] %v2473_v22 }
 0x294   :  { %1847 = vst.msk [vmem:[%s4613_s5 + $0xc8] sm:$0xff] %vm1822_vm2, %v2474_v60  ;;  %v1756_v3 = vpop.f32.mrb[20].mxu1 }
 0x295   :  { %v2475_v4 = vadd.f32 %v1756_v3, %v4358_v5  ;;  %v1758_v15 = vpop.f32.mrb[21].mxu1 }
 0x296   :  { %v2476_v8 = vadd.f32 %v1758_v15, %v4360_v2 }
 0x297   :  { %1848 = vst [vmem:[%s4613_s5 + $0xd0] sm:$0xff] %v2475_v4 }
 0x298   :  { %1849 = vst.msk [vmem:[%s4613_s5 + $0xd8] sm:$0xff] %vm1822_vm2, %v2476_v8  ;;  %v1762_v36 = vpop.f32.mrb[22].mxu1 }
 0x299   :  { %v2477_v16 = vadd.f32 %v1762_v36, %v4362_v30  ;;  %v1764_v57 = vpop.f32.mrb[23].mxu1 }
 0x29a   :  { %v2478_v49 = vadd.f32 %v1764_v57, %v4364_v37 }
 0x29b   :  { %1850 = vst [vmem:[%s4613_s5 + $0xe0] sm:$0xff] %v2477_v16 }
 0x29c   :  { %1851 = vst.msk [vmem:[%s4613_s5 + $0xe8] sm:$0xff] %vm1822_vm2, %v2478_v49  ;;  %v1768_v5 = vpop.f32.mrb[24].mxu1 }
 0x29d   :  { %v2479_v2 = vadd.f32 %v1768_v5, %v4366_v9  ;;  %v1770_v38 = vpop.f32.mrb[25].mxu1 }
 0x29e   :  { %v2480_v44 = vadd.f32 %v1770_v38, %v4368_v10 }
 0x29f   :  { %1852 = vst [vmem:[%s4613_s5 + $0xf0] sm:$0xff] %v2479_v2 }
 0x2a0   :  { %1853 = vst.msk [vmem:[%s4613_s5 + $0xf8] sm:$0xff] %vm1822_vm2, %v2480_v44  ;;  %v1774_v30 = vpop.f32.mrb[26].mxu1 }
 0x2a1   :  { %v2481_v37 = vadd.f32 %v1774_v30, %v4370_v12  ;;  %v1776_v6 = vpop.f32.mrb[27].mxu1 }
 0x2a2   :  { %v2482_v56 = vadd.f32 %v1776_v6, %v4372_v33 }
 0x2a3   :  { %1854 = vst [vmem:[%s4613_s5 + $0x100] sm:$0xff] %v2481_v37 }
 0x2a4   :  { %1855 = vst.msk [vmem:[%s4613_s5 + $0x108] sm:$0xff] %vm1822_vm2, %v2482_v56  ;;  %v1780_v9 = vpop.f32.mrb[28].mxu1 }
 0x2a5   :  { %v2483_v10 = vadd.f32 %v1780_v9, %v4374_v13  ;;  %v1782_v35 = vpop.f32.mrb[29].mxu1 }
 0x2a6   :  { %v2484_v47 = vadd.f32 %v1782_v35, %v4376_v18 }
 0x2a7   :  { %1856 = vst [vmem:[%s4613_s5 + $0x110] sm:$0xff] %v2483_v10 }
 0x2a8   :  { %1857 = vst.msk [vmem:[%s4613_s5 + $0x118] sm:$0xff] %vm1822_vm2, %v2484_v47  ;;  %v1786_v12 = vpop.f32.mrb[30].mxu1 }
 0x2a9   :  { %v2485_v33 = vadd.f32 %v1786_v12, %v4378_v61  ;;  %v1788_v63 = vpop.f32.mrb[31].mxu1 }
 0x2aa   :  { %v2486_v50 = vadd.f32 %v1788_v63, %v4380_v54 }
 0x2ab   :  { %1858 = vst [vmem:[%s4613_s5 + $0x120] sm:$0xff] %v2485_v33 }
 0x2ac   :  { %1859 = vst.msk [vmem:[%s4613_s5 + $0x128] sm:$0xff] %vm1822_vm2, %v2486_v50  ;;  %v1792_v13 = vpop.f32.mrb[32].mxu1 }
 0x2ad   :  { %v2487_v18 = vadd.f32 %v1792_v13, %v4382_v14  ;;  %v1794_v46 = vpop.f32.mrb[33].mxu1 }
 0x2ae   :  { %v2488_v28 = vadd.f32 %v1794_v46, %v4384_v41 }
 0x2af   :  { %1860 = vst [vmem:[%s4613_s5 + $0x130] sm:$0xff] %v2487_v18 }
 0x2b0   :  { %1861 = vst.msk [vmem:[%s4613_s5 + $0x138] sm:$0xff] %vm1822_vm2, %v2488_v28  ;;  %v1798_v61 = vpop.f32.mrb[34].mxu1 }
 0x2b1   :  { %v2489_v54 = vadd.f32 %v1798_v61, %v4386_v45  ;;  %v1800_v58 = vpop.f32.mrb[35].mxu1 }
 0x2b2   :  { %v2490_v20 = vadd.f32 %v1800_v58, %v4388_v19 }
 0x2b3   :  { %1862 = vst [vmem:[%s4613_s5 + $0x140] sm:$0xff] %v2489_v54 }
 0x2b4   :  { %1863 = vst.msk [vmem:[%s4613_s5 + $0x148] sm:$0xff] %vm1822_vm2, %v2490_v20  ;;  %v1804_v14 = vpop.f32.mrb[36].mxu1 }
 0x2b5   :  { %v2491_v41 = vadd.f32 %v1804_v14, %v4390_v21  ;;  %v1806_v55 = vpop.f32.mrb[37].mxu1 }
 0x2b6   :  { %v2492_v31 = vadd.f32 %v1806_v55, %v4392_v23 }
 0x2b7   :  { %1864 = vst [vmem:[%s4613_s5 + $0x150] sm:$0xff] %v2491_v41 }
 0x2b8   :  { %1865 = vst.msk [vmem:[%s4613_s5 + $0x158] sm:$0xff] %vm1822_vm2, %v2492_v31  ;;  %v1810_v45 = vpop.f32.mrb[38].mxu1 }
 0x2b9   :  { %v2493_v19 = vadd.f32 %v1810_v45, %v4394_v62  ;;  %v1812_v29 = vpop.f32.mrb[39].mxu1 }
 0x2ba   :  { %v2494_v11 = vadd.f32 %v1812_v29, %v4396_v24 }
 0x2bb   :  { %1866 = vst [vmem:[%s4613_s5 + $0x160] sm:$0xff] %v2493_v19 }
 0x2bc   :  { %1867 = vst.msk [vmem:[%s4613_s5 + $0x168] sm:$0xff] %vm1822_vm2, %v2494_v11  ;;  %v1816_v21 = vpop.f32.mrb[40].mxu1 }
 0x2bd   :  { %v2495_v23 = vadd.f32 %v1816_v21, %v4398_v27  ;;  %v1818_v42 = vpop.f32.mrb[41].mxu1 }
 0x2be   :  { %v2496_v34 = vadd.f32 %v1818_v42, %v4400_v25 }
 0x2bf   :  { %1868 = vst [vmem:[%s4613_s5 + $0x170] sm:$0xff] %v2495_v23 }
 0x2c0   :  { %1869 = vst.msk [vmem:[%s4613_s5 + $0x178] sm:$0xff] %vm1822_vm2, %v2496_v34 }

</bundles_post_ra>
